<compile_context>
chip_gen: v5e
topology: v5e:2x2
jax: 0.10.0
libtpu: 0.0.40
codegen_flags: <defaults>
</compile_context>

<pallas_src>
import functools

import jax
import jax.numpy as jnp
from jax.experimental import pallas as pl
from jax.experimental.pallas import tpu as pltpu


def _head_kernel(img_ref, emb_ref,
                 w1_ref, b1_ref,
                 wih_ref, whh_ref, bg_ref,
                 w2_ref, b2_ref,
                 w3_ref, b3_ref,
                 out_ref,
                 x3bf_sc, m_sc, l_sc, logits_sc,
                 *, n_tiles):
    """Grid axis 0 streams vocab tiles of w3/b3 (double-buffered by BlockSpec).

    Batch-side features (fc_1 + LSTM + fc_2) are computed once at tile 0 into
    VMEM scratch. Each tile's raw logits are stashed in `logits_sc` while the
    log-softmax normalizer is accumulated online; the last tile writes
    `logits - lse` into the VMEM-resident output block (single HBM writeback).
    """
    v = pl.program_id(0)
    Bp = img_ref.shape[0]
    D = w1_ref.shape[1]
    T = emb_ref.shape[0] // Bp
    vt = w3_ref.shape[1]

    @pl.when(v == 0)
    def _features():
        # ---- fc_1 + ReLU (bf16 operands, f32 MXU accumulation) --------------
        x1 = jnp.dot(img_ref[...], w1_ref[...],
                     preferred_element_type=jnp.float32) + b1_ref[...]
        x1 = jnp.maximum(x1, 0.0)                                  # (Bp, D) f32

        # ---- LSTM: hoisted, gate-fused input projection for ALL timesteps ---
        # One (T*Bp, E) @ (E, 4D) matmul with (b_ih + b_hh) folded in; only
        # h @ W_hh remains on the serial path (one fused matmul per step).
        xg = jnp.dot(emb_ref[...], wih_ref[...],
                     preferred_element_type=jnp.float32) + bg_ref[...]
        whh = whh_ref[...]                                          # (D, 4D) bf16

        h = jnp.zeros((Bp, D), jnp.float32)
        c = jnp.zeros((Bp, D), jnp.float32)
        # Statically unrolled recurrence (torch gate order i, f, g, o).
        # TODO(synk): switch to chunked lax.fori_loop(..., unroll=k) if T grows.
        for t in range(T):
            g = xg[t * Bp:(t + 1) * Bp] + jnp.dot(
                h.astype(jnp.bfloat16), whh, preferred_element_type=jnp.float32)
            gi = jax.nn.sigmoid(g[:, 0 * D:1 * D])
            gf = jax.nn.sigmoid(g[:, 1 * D:2 * D])
            gg = jnp.tanh(g[:, 2 * D:3 * D])
            go = jax.nn.sigmoid(g[:, 3 * D:4 * D])
            c = gf * c + gi * gg
            h = go * jnp.tanh(c)                                    # (Bp, D) f32

        # ---- fc_2 + ReLU on fused features; cache once as bf16 for fc_3 -----
        fused = (x1 + h).astype(w2_ref.dtype)
        x3 = jnp.dot(fused, w2_ref[...],
                     preferred_element_type=jnp.float32) + b2_ref[...]
        x3bf_sc[...] = jnp.maximum(x3, 0.0).astype(x3bf_sc.dtype)

        # Init online-logsumexp accumulators.
        m_sc[...] = jnp.full_like(m_sc, -jnp.inf)
        l_sc[...] = jnp.zeros_like(l_sc)

    # ---- fc_3 on this vocab tile: stash raw logits + online logsumexp --------
    logits = jnp.dot(x3bf_sc[...], w3_ref[...],
                     preferred_element_type=jnp.float32) + b3_ref[...]   # (Bp, vt)
    logits_sc[v] = logits

    m_prev = m_sc[...]
    m_new = jnp.maximum(m_prev, jnp.max(logits, axis=-1, keepdims=True))
    l_sc[...] = (l_sc[...] * jnp.exp(m_prev - m_new)
                 + jnp.sum(jnp.exp(logits - m_new), axis=-1, keepdims=True))
    m_sc[...] = m_new

    @pl.when(v == n_tiles - 1)
    def _finalize():
        lse = m_sc[...] + jnp.log(l_sc[...])
        # Static reassembly into the VMEM-resident output block (lane-dense,
        # single HBM writeback at grid end).
        for k in range(n_tiles):
            out_ref[:, k * vt:(k + 1) * vt] = logits_sc[k] - lse


def _pick_vocab_tile(V, D, E, T, B_pad, budget_bytes=40 << 20):
    """Largest lane-aligned tile of the streamed fc_3 weight that divides V and
    keeps resident weights + double-buffered w3/b3 stream + logits/out buffers
    under the VMEM budget (sized against v7x's 64 MiB; generous on v5e/v6e)."""
    resident = 2 * (4096 * D + E * 4 * D + D * 4 * D + D * D        # bf16 weights
                    + B_pad * 4096 + T * B_pad * E)                 # bf16 activations
    resident += 2 * B_pad * V * 4                                   # logits scratch + out
    for t in (4096, 2048, 1024, 512, 256, 128):
        if V % t == 0 and resident + 2 * (D * t * 2 + t * 4) <= budget_bytes:
            return t
    return V


def network_forward(img_in, caption_in, params, *, vocab_tile=None):
    """img_in: (B, 4096) f32; caption_in: (B, T) int32 -> (B, vocab) log-probs."""
    emb_tbl = params["embedding"]
    B, T = caption_in.shape
    E = emb_tbl.shape[1]
    D = params["w1"].shape[1]
    V = params["w3"].shape[1]

    # Pad batch to a sublane multiple (>= 8): at tiny B most MXU/vreg rows were
    # hardware padding anyway, so this is ~free and multiplies utilization.
    B_pad = max(8, -(-B // 8) * 8)

    # Embedding lookup (gather) is glue: plain JAX, then pad the batch, go
    # time-major and flatten to (T*B_pad, E) so the fused LSTM input projection
    # covers every timestep in one matmul.
    emb = jnp.take(emb_tbl, caption_in, axis=0)                     # (B, T, E)
    emb = jnp.pad(emb, ((0, B_pad - B), (0, 0), (0, 0)))            # (B_pad, T, E)
    emb = jnp.transpose(emb, (1, 0, 2)).reshape(T * B_pad, E)       # row = t*B_pad + b
    img = jnp.pad(img_in, ((0, B_pad - B), (0, 0)))

    # dtype policy: all matmul operands bf16 (f32 MXU accumulation); biases,
    # gates, LSTM state and every elementwise/softmax op stay f32.
    img_bf = img.astype(jnp.bfloat16)
    emb_bf = emb.astype(jnp.bfloat16)
    w1 = params["w1"].astype(jnp.bfloat16)
    w2 = params["w2"].astype(jnp.bfloat16)
    w3 = params["w3"].astype(jnp.bfloat16)
    wih = params["w_ih"].astype(jnp.bfloat16)          # (E, 4D), torch order i,f,g,o
    whh = params["w_hh"].astype(jnp.bfloat16)          # (D, 4D)
    b1 = params["b1"].astype(jnp.float32)
    b2 = params["b2"].astype(jnp.float32)
    b3 = params["b3"].astype(jnp.float32)
    bg = (params["b_ih"] + params["b_hh"]).astype(jnp.float32)      # pre-summed

    if vocab_tile is None:
        vocab_tile = _pick_vocab_tile(V, D, E, T, B_pad)
    assert V % vocab_tile == 0, "vocab size must be divisible by vocab_tile"
    n_tiles = V // vocab_tile

    const = lambda v: (0, 0)   # resident-in-VMEM operands (constant block index)
    tiled = lambda v: (0, v)   # streamed over the vocab grid axis

    in_specs = [
        pl.BlockSpec((B_pad, 4096), const),        # img
        pl.BlockSpec((T * B_pad, E), const),       # emb (time-major, flattened)
        pl.BlockSpec((4096, D), const),            # w1
        pl.BlockSpec((1, D), const),               # b1
        pl.BlockSpec((E, 4 * D), const),           # w_ih (gate-fused)
        pl.BlockSpec((D, 4 * D), const),           # w_hh (gate-fused, bf16)
        pl.BlockSpec((1, 4 * D), const),           # b_ih + b_hh
        pl.BlockSpec((D, D), const),               # w2
        pl.BlockSpec((1, D), const),               # b2
        pl.BlockSpec((D, vocab_tile), tiled),      # w3 tile (double-buffered)
        pl.BlockSpec((1, vocab_tile), tiled),      # b3 tile
    ]

    out = pl.pallas_call(
        functools.partial(_head_kernel, n_tiles=n_tiles),
        out_shape=jax.ShapeDtypeStruct((B_pad, V), jnp.float32),    # log-probs
        grid_spec=pltpu.PrefetchScalarGridSpec(
            num_scalar_prefetch=0,
            grid=(n_tiles,),
            in_specs=in_specs,
            # Constant block index -> output stays resident in VMEM across the
            # whole vocab sweep and is written back to HBM exactly once.
            out_specs=pl.BlockSpec((B_pad, V), const),
            scratch_shapes=[
                pltpu.VMEM((B_pad, D), jnp.bfloat16),                # x3 (bf16 cache)
                pltpu.VMEM((B_pad, 1), jnp.float32),                 # running max
                pltpu.VMEM((B_pad, 1), jnp.float32),                 # running sum-exp
                pltpu.VMEM((n_tiles, B_pad, vocab_tile), jnp.float32),  # raw logits
            ],
        ),
        compiler_params=pltpu.CompilerParams(
            # Online lse / resident output carried across vocab tiles -> the
            # axis must stay "arbitrary" (see v7x core-split TODO at top).
            dimension_semantics=("arbitrary",),
            vmem_limit_bytes=48 * 1024 * 1024),
    )(img_bf, emb_bf, w1, b1, wih, whh, bg, w2, b2, w3, b3)

    return out[:B]


def init_params(key, depth, embedding_dim, vocab_size):
    """Deterministic synthetic params. Linear weights stored as (in, out) i.e. W^T."""
    ks = jax.random.split(key, 8)

    def linear(k, fan_in, fan_out):
        s = 1.0 / jnp.sqrt(jnp.float32(fan_in))
        kw, kb = jax.random.split(k)
        w = jax.random.uniform(kw, (fan_in, fan_out), jnp.float32, -s, s)
        b = jax.random.uniform(kb, (1, fan_out), jnp.float32, -s, s)
        return w, b

    w1, b1 = linear(ks[0], 4096, depth)
    w2, b2 = linear(ks[1], depth, depth)
    w3, b3 = linear(ks[2], depth, vocab_size)

    s = 1.0 / jnp.sqrt(jnp.float32(depth))
    w_ih = jax.random.uniform(ks[3], (embedding_dim, 4 * depth), jnp.float32, -s, s)
    w_hh = jax.random.uniform(ks[4], (depth, 4 * depth), jnp.float32, -s, s)
    b_ih = jax.random.uniform(ks[5], (1, 4 * depth), jnp.float32, -s, s)
    b_hh = jax.random.uniform(ks[6], (1, 4 * depth), jnp.float32, -s, s)

    # Stand-in for glove_weights (Embedding(vocab_size, embedding_dim)).
    embedding = jax.random.normal(ks[7], (vocab_size, embedding_dim), jnp.float32)

    return dict(w1=w1, b1=b1, w2=w2, b2=b2, w3=w3, b3=b3,
                w_ih=w_ih, b_ih=b_ih, w_hh=w_hh, b_hh=b_hh,
                embedding=embedding)


def _reference_forward(img_in, caption_in, params):
    """Pure-JAX f32 reference mirroring the PyTorch forward (inference)."""
    D = params["w1"].shape[1]
    x1 = jnp.maximum(img_in @ params["w1"] + params["b1"], 0.0)
    emb = jnp.take(params["embedding"], caption_in, axis=0)          # (B, T, E)
    B, T = caption_in.shape
    h = jnp.zeros((B, D), jnp.float32)
    c = jnp.zeros((B, D), jnp.float32)
    for t in range(T):
        g = (emb[:, t, :] @ params["w_ih"] + params["b_ih"]
             + h @ params["w_hh"] + params["b_hh"])
        gi = jax.nn.sigmoid(g[:, 0 * D:1 * D])
        gf = jax.nn.sigmoid(g[:, 1 * D:2 * D])
        gg = jnp.tanh(g[:, 2 * D:3 * D])
        go = jax.nn.sigmoid(g[:, 3 * D:4 * D])
        c = gf * c + gi * gg
        h = go * jnp.tanh(c)
    x3 = jnp.maximum((x1 + h) @ params["w2"] + params["b2"], 0.0)
    logits = x3 @ params["w3"] + params["b3"]
    return jax.nn.log_softmax(logits, axis=-1)


if __name__ == "__main__":
    B, T = 2, 8
    depth, embedding_dim, vocab_size = 32, 32, 1024

    key = jax.random.PRNGKey(0)
    k_params, k_img, k_cap = jax.random.split(key, 3)

    params = init_params(k_params, depth, embedding_dim, vocab_size)
    img_in = jax.random.normal(k_img, (B, 4096), jnp.float32)
    caption_in = jax.random.randint(k_cap, (B, T), 0, vocab_size, dtype=jnp.int32)

    # vocab_tile=256 -> 4 streamed w3 tiles: exercises the online-logsumexp +
    # fused log_softmax finalize path.
    out = network_forward(img_in, caption_in, params, vocab_tile=256)
    out = jax.block_until_ready(out)

    assert out.shape == (B, vocab_size)
    # log_softmax rows should sum to 1 after exp.
    assert bool(jnp.all(jnp.abs(jnp.sum(jnp.exp(out), axis=-1) - 1.0) < 1e-3))
    # f32 reference check (bf16 streamed matmuls -> loose tolerance).
    ref = _reference_forward(img_in, caption_in, params)
    max_err = float(jnp.max(jnp.abs(out - ref)))
    assert max_err < 8e-2, max_err
    print("KERNEL_OK")
</pallas_src>

<mosaic_0001>
module attributes {stable_mosaic.version = 11 : i64} {
  func.func @_head_kernel(%arg0: i32, %arg1: memref<8x4096xbf16, #tpu.memory_space<vmem>>, %arg2: memref<64x32xbf16, #tpu.memory_space<vmem>>, %arg3: memref<4096x32xbf16, #tpu.memory_space<vmem>>, %arg4: memref<1x32xf32, #tpu.memory_space<vmem>>, %arg5: memref<32x128xbf16, #tpu.memory_space<vmem>>, %arg6: memref<32x128xbf16, #tpu.memory_space<vmem>>, %arg7: memref<1x128xf32, #tpu.memory_space<vmem>>, %arg8: memref<32x32xbf16, #tpu.memory_space<vmem>>, %arg9: memref<1x32xf32, #tpu.memory_space<vmem>>, %arg10: memref<32x256xbf16, #tpu.memory_space<vmem>>, %arg11: memref<1x256xf32, #tpu.memory_space<vmem>>, %arg12: memref<8x1024xf32, #tpu.memory_space<vmem>>, %arg13: memref<8x32xbf16, #tpu.memory_space<vmem>>, %arg14: memref<8x1xf32, #tpu.memory_space<vmem>>, %arg15: memref<8x1xf32, #tpu.memory_space<vmem>>, %arg16: memref<4x8x256xf32, #tpu.memory_space<vmem>>) attributes {dimension_semantics = [#tpu.dimension_semantics<arbitrary>], iteration_bounds = array<i64: 4>, scalar_prefetch = 0 : i64, scratch_operands = 4 : i64, tpu.core_type = #tpu.core_type<tc>, window_params = [{pipeline_mode = #tpu.pipeline_mode<synchronous>, transform_indices = @transform_0, window_bounds = array<i64: 8, 4096>}, {pipeline_mode = #tpu.pipeline_mode<synchronous>, transform_indices = @transform_1, window_bounds = array<i64: 64, 32>}, {pipeline_mode = #tpu.pipeline_mode<synchronous>, transform_indices = @transform_2, window_bounds = array<i64: 4096, 32>}, {pipeline_mode = #tpu.pipeline_mode<synchronous>, transform_indices = @transform_3, window_bounds = array<i64: 1, 32>}, {pipeline_mode = #tpu.pipeline_mode<synchronous>, transform_indices = @transform_4, window_bounds = array<i64: 32, 128>}, {pipeline_mode = #tpu.pipeline_mode<synchronous>, transform_indices = @transform_5, window_bounds = array<i64: 32, 128>}, {pipeline_mode = #tpu.pipeline_mode<synchronous>, transform_indices = @transform_6, window_bounds = array<i64: 1, 128>}, {pipeline_mode = #tpu.pipeline_mode<synchronous>, transform_indices = @transform_7, window_bounds = array<i64: 32, 32>}, {pipeline_mode = #tpu.pipeline_mode<synchronous>, transform_indices = @transform_8, window_bounds = array<i64: 1, 32>}, {transform_indices = @transform_9, window_bounds = array<i64: 32, 256>}, {transform_indices = @transform_10, window_bounds = array<i64: 1, 256>}, {pipeline_mode = #tpu.pipeline_mode<synchronous>, transform_indices = @transform_11, window_bounds = array<i64: 8, 1024>}]} {
    %c0_i32 = arith.constant 0 : i32
    %0 = arith.cmpi eq, %arg0, %c0_i32 : i32
    %1 = arith.extui %0 : i1 to i32
    %c0_i32_0 = arith.constant 0 : i32
    %2 = arith.cmpi ne, %1, %c0_i32_0 : i32
    scf.if %2 {
      %c0_19 = arith.constant 0 : index
      %c0_20 = arith.constant 0 : index
      %32 = vector.load %arg1[%c0_19, %c0_20] : memref<8x4096xbf16, #tpu.memory_space<vmem>>, vector<8x4096xbf16>
      %c0_21 = arith.constant 0 : index
      %c0_22 = arith.constant 0 : index
      %33 = vector.load %arg3[%c0_21, %c0_22] : memref<4096x32xbf16, #tpu.memory_space<vmem>>, vector<4096x32xbf16>
      %cst_23 = arith.constant dense<0.000000e+00> : vector<8x32xf32>
      %34 = tpu.matmul %32, %33, %cst_23 {dimension_numbers = #tpu.dot_dimension_numbers<[1], [0], [0], [1], [0, 0, 1, 1], [], []>} : vector<8x4096xbf16>, vector<4096x32xbf16>, vector<8x32xf32> -> vector<8x32xf32>
      %c0_24 = arith.constant 0 : index
      %c0_25 = arith.constant 0 : index
      %35 = vector.load %arg4[%c0_24, %c0_25] : memref<1x32xf32, #tpu.memory_space<vmem>>, vector<1x32xf32>
      %36 = vector.broadcast %35 : vector<1x32xf32> to vector<8x32xf32>
      %37 = arith.addf %34, %36 : vector<8x32xf32>
      %cst_26 = arith.constant 0.000000e+00 : f32
      %38 = vector.broadcast %cst_26 : f32 to vector<8x32xf32>
      %39 = arith.maximumf %37, %38 : vector<8x32xf32>
      %c0_27 = arith.constant 0 : index
      %c0_28 = arith.constant 0 : index
      %40 = vector.load %arg2[%c0_27, %c0_28] : memref<64x32xbf16, #tpu.memory_space<vmem>>, vector<64x32xbf16>
      %c0_29 = arith.constant 0 : index
      %c0_30 = arith.constant 0 : index
      %41 = vector.load %arg5[%c0_29, %c0_30] : memref<32x128xbf16, #tpu.memory_space<vmem>>, vector<32x128xbf16>
      %cst_31 = arith.constant dense<0.000000e+00> : vector<64x128xf32>
      %42 = tpu.matmul %40, %41, %cst_31 {dimension_numbers = #tpu.dot_dimension_numbers<[1], [0], [0], [1], [0, 0, 1, 1], [], []>} : vector<64x32xbf16>, vector<32x128xbf16>, vector<64x128xf32> -> vector<64x128xf32>
      %c0_32 = arith.constant 0 : index
      %c0_33 = arith.constant 0 : index
      %43 = vector.load %arg7[%c0_32, %c0_33] : memref<1x128xf32, #tpu.memory_space<vmem>>, vector<1x128xf32>
      %44 = vector.broadcast %43 : vector<1x128xf32> to vector<64x128xf32>
      %45 = arith.addf %42, %44 : vector<64x128xf32>
      %c0_34 = arith.constant 0 : index
      %c0_35 = arith.constant 0 : index
      %46 = vector.load %arg6[%c0_34, %c0_35] : memref<32x128xbf16, #tpu.memory_space<vmem>>, vector<32x128xbf16>
      %cst_36 = arith.constant 0.000000e+00 : f32
      %47 = vector.broadcast %cst_36 : f32 to vector<8x32xf32>
      %cst_37 = arith.constant 0.000000e+00 : f32
      %48 = vector.broadcast %cst_37 : f32 to vector<8x32xf32>
      %49 = vector.extract_strided_slice %45 {offsets = [0, 0], sizes = [8, 128], strides = [1, 1]} : vector<64x128xf32> to vector<8x128xf32>
      %50 = arith.truncf %47 : vector<8x32xf32> to vector<8x32xbf16>
      %cst_38 = arith.constant dense<0.000000e+00> : vector<8x128xf32>
      %51 = tpu.matmul %50, %46, %cst_38 {dimension_numbers = #tpu.dot_dimension_numbers<[1], [0], [0], [1], [0, 0, 1, 1], [], []>} : vector<8x32xbf16>, vector<32x128xbf16>, vector<8x128xf32> -> vector<8x128xf32>
      %52 = arith.addf %49, %51 : vector<8x128xf32>
      %53 = vector.extract_strided_slice %52 {offsets = [0, 0], sizes = [8, 32], strides = [1, 1]} : vector<8x128xf32> to vector<8x32xf32>
      %54 = arith.negf %53 : vector<8x32xf32>
      %55 = math.exp %54 : vector<8x32xf32>
      %cst_39 = arith.constant 1.000000e+00 : f32
      %56 = vector.broadcast %cst_39 : f32 to vector<8x32xf32>
      %57 = arith.addf %56, %55 : vector<8x32xf32>
      %58 = arith.divf %56, %57 : vector<8x32xf32>
      %59 = vector.extract_strided_slice %52 {offsets = [0, 32], sizes = [8, 32], strides = [1, 1]} : vector<8x128xf32> to vector<8x32xf32>
      %60 = arith.negf %59 : vector<8x32xf32>
      %61 = math.exp %60 : vector<8x32xf32>
      %cst_40 = arith.constant 1.000000e+00 : f32
      %62 = vector.broadcast %cst_40 : f32 to vector<8x32xf32>
      %63 = arith.addf %62, %61 : vector<8x32xf32>
      %64 = arith.divf %62, %63 : vector<8x32xf32>
      %65 = vector.extract_strided_slice %52 {offsets = [0, 64], sizes = [8, 32], strides = [1, 1]} : vector<8x128xf32> to vector<8x32xf32>
      %66 = math.tanh %65 : vector<8x32xf32>
      %67 = vector.extract_strided_slice %52 {offsets = [0, 96], sizes = [8, 32], strides = [1, 1]} : vector<8x128xf32> to vector<8x32xf32>
      %68 = arith.negf %67 : vector<8x32xf32>
      %69 = math.exp %68 : vector<8x32xf32>
      %cst_41 = arith.constant 1.000000e+00 : f32
      %70 = vector.broadcast %cst_41 : f32 to vector<8x32xf32>
      %71 = arith.addf %70, %69 : vector<8x32xf32>
      %72 = arith.divf %70, %71 : vector<8x32xf32>
      %73 = arith.mulf %64, %48 : vector<8x32xf32>
      %74 = arith.mulf %58, %66 : vector<8x32xf32>
      %75 = arith.addf %73, %74 : vector<8x32xf32>
      %76 = math.tanh %75 : vector<8x32xf32>
      %77 = arith.mulf %72, %76 : vector<8x32xf32>
      %78 = vector.extract_strided_slice %45 {offsets = [8, 0], sizes = [8, 128], strides = [1, 1]} : vector<64x128xf32> to vector<8x128xf32>
      %79 = arith.truncf %77 : vector<8x32xf32> to vector<8x32xbf16>
      %cst_42 = arith.constant dense<0.000000e+00> : vector<8x128xf32>
      %80 = tpu.matmul %79, %46, %cst_42 {dimension_numbers = #tpu.dot_dimension_numbers<[1], [0], [0], [1], [0, 0, 1, 1], [], []>} : vector<8x32xbf16>, vector<32x128xbf16>, vector<8x128xf32> -> vector<8x128xf32>
      %81 = arith.addf %78, %80 : vector<8x128xf32>
      %82 = vector.extract_strided_slice %81 {offsets = [0, 0], sizes = [8, 32], strides = [1, 1]} : vector<8x128xf32> to vector<8x32xf32>
      %83 = arith.negf %82 : vector<8x32xf32>
      %84 = math.exp %83 : vector<8x32xf32>
      %cst_43 = arith.constant 1.000000e+00 : f32
      %85 = vector.broadcast %cst_43 : f32 to vector<8x32xf32>
      %86 = arith.addf %85, %84 : vector<8x32xf32>
      %87 = arith.divf %85, %86 : vector<8x32xf32>
      %88 = vector.extract_strided_slice %81 {offsets = [0, 32], sizes = [8, 32], strides = [1, 1]} : vector<8x128xf32> to vector<8x32xf32>
      %89 = arith.negf %88 : vector<8x32xf32>
      %90 = math.exp %89 : vector<8x32xf32>
      %cst_44 = arith.constant 1.000000e+00 : f32
      %91 = vector.broadcast %cst_44 : f32 to vector<8x32xf32>
      %92 = arith.addf %91, %90 : vector<8x32xf32>
      %93 = arith.divf %91, %92 : vector<8x32xf32>
      %94 = vector.extract_strided_slice %81 {offsets = [0, 64], sizes = [8, 32], strides = [1, 1]} : vector<8x128xf32> to vector<8x32xf32>
      %95 = math.tanh %94 : vector<8x32xf32>
      %96 = vector.extract_strided_slice %81 {offsets = [0, 96], sizes = [8, 32], strides = [1, 1]} : vector<8x128xf32> to vector<8x32xf32>
      %97 = arith.negf %96 : vector<8x32xf32>
      %98 = math.exp %97 : vector<8x32xf32>
      %cst_45 = arith.constant 1.000000e+00 : f32
      %99 = vector.broadcast %cst_45 : f32 to vector<8x32xf32>
      %100 = arith.addf %99, %98 : vector<8x32xf32>
      %101 = arith.divf %99, %100 : vector<8x32xf32>
      %102 = arith.mulf %93, %75 : vector<8x32xf32>
      %103 = arith.mulf %87, %95 : vector<8x32xf32>
      %104 = arith.addf %102, %103 : vector<8x32xf32>
      %105 = math.tanh %104 : vector<8x32xf32>
      %106 = arith.mulf %101, %105 : vector<8x32xf32>
      %107 = vector.extract_strided_slice %45 {offsets = [16, 0], sizes = [8, 128], strides = [1, 1]} : vector<64x128xf32> to vector<8x128xf32>
      %108 = arith.truncf %106 : vector<8x32xf32> to vector<8x32xbf16>
      %cst_46 = arith.constant dense<0.000000e+00> : vector<8x128xf32>
      %109 = tpu.matmul %108, %46, %cst_46 {dimension_numbers = #tpu.dot_dimension_numbers<[1], [0], [0], [1], [0, 0, 1, 1], [], []>} : vector<8x32xbf16>, vector<32x128xbf16>, vector<8x128xf32> -> vector<8x128xf32>
      %110 = arith.addf %107, %109 : vector<8x128xf32>
      %111 = vector.extract_strided_slice %110 {offsets = [0, 0], sizes = [8, 32], strides = [1, 1]} : vector<8x128xf32> to vector<8x32xf32>
      %112 = arith.negf %111 : vector<8x32xf32>
      %113 = math.exp %112 : vector<8x32xf32>
      %cst_47 = arith.constant 1.000000e+00 : f32
      %114 = vector.broadcast %cst_47 : f32 to vector<8x32xf32>
      %115 = arith.addf %114, %113 : vector<8x32xf32>
      %116 = arith.divf %114, %115 : vector<8x32xf32>
      %117 = vector.extract_strided_slice %110 {offsets = [0, 32], sizes = [8, 32], strides = [1, 1]} : vector<8x128xf32> to vector<8x32xf32>
      %118 = arith.negf %117 : vector<8x32xf32>
      %119 = math.exp %118 : vector<8x32xf32>
      %cst_48 = arith.constant 1.000000e+00 : f32
      %120 = vector.broadcast %cst_48 : f32 to vector<8x32xf32>
      %121 = arith.addf %120, %119 : vector<8x32xf32>
      %122 = arith.divf %120, %121 : vector<8x32xf32>
      %123 = vector.extract_strided_slice %110 {offsets = [0, 64], sizes = [8, 32], strides = [1, 1]} : vector<8x128xf32> to vector<8x32xf32>
      %124 = math.tanh %123 : vector<8x32xf32>
      %125 = vector.extract_strided_slice %110 {offsets = [0, 96], sizes = [8, 32], strides = [1, 1]} : vector<8x128xf32> to vector<8x32xf32>
      %126 = arith.negf %125 : vector<8x32xf32>
      %127 = math.exp %126 : vector<8x32xf32>
      %cst_49 = arith.constant 1.000000e+00 : f32
      %128 = vector.broadcast %cst_49 : f32 to vector<8x32xf32>
      %129 = arith.addf %128, %127 : vector<8x32xf32>
      %130 = arith.divf %128, %129 : vector<8x32xf32>
      %131 = arith.mulf %122, %104 : vector<8x32xf32>
      %132 = arith.mulf %116, %124 : vector<8x32xf32>
      %133 = arith.addf %131, %132 : vector<8x32xf32>
      %134 = math.tanh %133 : vector<8x32xf32>
      %135 = arith.mulf %130, %134 : vector<8x32xf32>
      %136 = vector.extract_strided_slice %45 {offsets = [24, 0], sizes = [8, 128], strides = [1, 1]} : vector<64x128xf32> to vector<8x128xf32>
      %137 = arith.truncf %135 : vector<8x32xf32> to vector<8x32xbf16>
      %cst_50 = arith.constant dense<0.000000e+00> : vector<8x128xf32>
      %138 = tpu.matmul %137, %46, %cst_50 {dimension_numbers = #tpu.dot_dimension_numbers<[1], [0], [0], [1], [0, 0, 1, 1], [], []>} : vector<8x32xbf16>, vector<32x128xbf16>, vector<8x128xf32> -> vector<8x128xf32>
      %139 = arith.addf %136, %138 : vector<8x128xf32>
      %140 = vector.extract_strided_slice %139 {offsets = [0, 0], sizes = [8, 32], strides = [1, 1]} : vector<8x128xf32> to vector<8x32xf32>
      %141 = arith.negf %140 : vector<8x32xf32>
      %142 = math.exp %141 : vector<8x32xf32>
      %cst_51 = arith.constant 1.000000e+00 : f32
      %143 = vector.broadcast %cst_51 : f32 to vector<8x32xf32>
      %144 = arith.addf %143, %142 : vector<8x32xf32>
      %145 = arith.divf %143, %144 : vector<8x32xf32>
      %146 = vector.extract_strided_slice %139 {offsets = [0, 32], sizes = [8, 32], strides = [1, 1]} : vector<8x128xf32> to vector<8x32xf32>
      %147 = arith.negf %146 : vector<8x32xf32>
      %148 = math.exp %147 : vector<8x32xf32>
      %cst_52 = arith.constant 1.000000e+00 : f32
      %149 = vector.broadcast %cst_52 : f32 to vector<8x32xf32>
      %150 = arith.addf %149, %148 : vector<8x32xf32>
      %151 = arith.divf %149, %150 : vector<8x32xf32>
      %152 = vector.extract_strided_slice %139 {offsets = [0, 64], sizes = [8, 32], strides = [1, 1]} : vector<8x128xf32> to vector<8x32xf32>
      %153 = math.tanh %152 : vector<8x32xf32>
      %154 = vector.extract_strided_slice %139 {offsets = [0, 96], sizes = [8, 32], strides = [1, 1]} : vector<8x128xf32> to vector<8x32xf32>
      %155 = arith.negf %154 : vector<8x32xf32>
      %156 = math.exp %155 : vector<8x32xf32>
      %cst_53 = arith.constant 1.000000e+00 : f32
      %157 = vector.broadcast %cst_53 : f32 to vector<8x32xf32>
      %158 = arith.addf %157, %156 : vector<8x32xf32>
      %159 = arith.divf %157, %158 : vector<8x32xf32>
      %160 = arith.mulf %151, %133 : vector<8x32xf32>
      %161 = arith.mulf %145, %153 : vector<8x32xf32>
      %162 = arith.addf %160, %161 : vector<8x32xf32>
      %163 = math.tanh %162 : vector<8x32xf32>
      %164 = arith.mulf %159, %163 : vector<8x32xf32>
      %165 = vector.extract_strided_slice %45 {offsets = [32, 0], sizes = [8, 128], strides = [1, 1]} : vector<64x128xf32> to vector<8x128xf32>
      %166 = arith.truncf %164 : vector<8x32xf32> to vector<8x32xbf16>
      %cst_54 = arith.constant dense<0.000000e+00> : vector<8x128xf32>
      %167 = tpu.matmul %166, %46, %cst_54 {dimension_numbers = #tpu.dot_dimension_numbers<[1], [0], [0], [1], [0, 0, 1, 1], [], []>} : vector<8x32xbf16>, vector<32x128xbf16>, vector<8x128xf32> -> vector<8x128xf32>
      %168 = arith.addf %165, %167 : vector<8x128xf32>
      %169 = vector.extract_strided_slice %168 {offsets = [0, 0], sizes = [8, 32], strides = [1, 1]} : vector<8x128xf32> to vector<8x32xf32>
      %170 = arith.negf %169 : vector<8x32xf32>
      %171 = math.exp %170 : vector<8x32xf32>
      %cst_55 = arith.constant 1.000000e+00 : f32
      %172 = vector.broadcast %cst_55 : f32 to vector<8x32xf32>
      %173 = arith.addf %172, %171 : vector<8x32xf32>
      %174 = arith.divf %172, %173 : vector<8x32xf32>
      %175 = vector.extract_strided_slice %168 {offsets = [0, 32], sizes = [8, 32], strides = [1, 1]} : vector<8x128xf32> to vector<8x32xf32>
      %176 = arith.negf %175 : vector<8x32xf32>
      %177 = math.exp %176 : vector<8x32xf32>
      %cst_56 = arith.constant 1.000000e+00 : f32
      %178 = vector.broadcast %cst_56 : f32 to vector<8x32xf32>
      %179 = arith.addf %178, %177 : vector<8x32xf32>
      %180 = arith.divf %178, %179 : vector<8x32xf32>
      %181 = vector.extract_strided_slice %168 {offsets = [0, 64], sizes = [8, 32], strides = [1, 1]} : vector<8x128xf32> to vector<8x32xf32>
      %182 = math.tanh %181 : vector<8x32xf32>
      %183 = vector.extract_strided_slice %168 {offsets = [0, 96], sizes = [8, 32], strides = [1, 1]} : vector<8x128xf32> to vector<8x32xf32>
      %184 = arith.negf %183 : vector<8x32xf32>
      %185 = math.exp %184 : vector<8x32xf32>
      %cst_57 = arith.constant 1.000000e+00 : f32
      %186 = vector.broadcast %cst_57 : f32 to vector<8x32xf32>
      %187 = arith.addf %186, %185 : vector<8x32xf32>
      %188 = arith.divf %186, %187 : vector<8x32xf32>
      %189 = arith.mulf %180, %162 : vector<8x32xf32>
      %190 = arith.mulf %174, %182 : vector<8x32xf32>
      %191 = arith.addf %189, %190 : vector<8x32xf32>
      %192 = math.tanh %191 : vector<8x32xf32>
      %193 = arith.mulf %188, %192 : vector<8x32xf32>
      %194 = vector.extract_strided_slice %45 {offsets = [40, 0], sizes = [8, 128], strides = [1, 1]} : vector<64x128xf32> to vector<8x128xf32>
      %195 = arith.truncf %193 : vector<8x32xf32> to vector<8x32xbf16>
      %cst_58 = arith.constant dense<0.000000e+00> : vector<8x128xf32>
      %196 = tpu.matmul %195, %46, %cst_58 {dimension_numbers = #tpu.dot_dimension_numbers<[1], [0], [0], [1], [0, 0, 1, 1], [], []>} : vector<8x32xbf16>, vector<32x128xbf16>, vector<8x128xf32> -> vector<8x128xf32>
      %197 = arith.addf %194, %196 : vector<8x128xf32>
      %198 = vector.extract_strided_slice %197 {offsets = [0, 0], sizes = [8, 32], strides = [1, 1]} : vector<8x128xf32> to vector<8x32xf32>
      %199 = arith.negf %198 : vector<8x32xf32>
      %200 = math.exp %199 : vector<8x32xf32>
      %cst_59 = arith.constant 1.000000e+00 : f32
      %201 = vector.broadcast %cst_59 : f32 to vector<8x32xf32>
      %202 = arith.addf %201, %200 : vector<8x32xf32>
      %203 = arith.divf %201, %202 : vector<8x32xf32>
      %204 = vector.extract_strided_slice %197 {offsets = [0, 32], sizes = [8, 32], strides = [1, 1]} : vector<8x128xf32> to vector<8x32xf32>
      %205 = arith.negf %204 : vector<8x32xf32>
      %206 = math.exp %205 : vector<8x32xf32>
      %cst_60 = arith.constant 1.000000e+00 : f32
      %207 = vector.broadcast %cst_60 : f32 to vector<8x32xf32>
      %208 = arith.addf %207, %206 : vector<8x32xf32>
      %209 = arith.divf %207, %208 : vector<8x32xf32>
      %210 = vector.extract_strided_slice %197 {offsets = [0, 64], sizes = [8, 32], strides = [1, 1]} : vector<8x128xf32> to vector<8x32xf32>
      %211 = math.tanh %210 : vector<8x32xf32>
      %212 = vector.extract_strided_slice %197 {offsets = [0, 96], sizes = [8, 32], strides = [1, 1]} : vector<8x128xf32> to vector<8x32xf32>
      %213 = arith.negf %212 : vector<8x32xf32>
      %214 = math.exp %213 : vector<8x32xf32>
      %cst_61 = arith.constant 1.000000e+00 : f32
      %215 = vector.broadcast %cst_61 : f32 to vector<8x32xf32>
      %216 = arith.addf %215, %214 : vector<8x32xf32>
      %217 = arith.divf %215, %216 : vector<8x32xf32>
      %218 = arith.mulf %209, %191 : vector<8x32xf32>
      %219 = arith.mulf %203, %211 : vector<8x32xf32>
      %220 = arith.addf %218, %219 : vector<8x32xf32>
      %221 = math.tanh %220 : vector<8x32xf32>
      %222 = arith.mulf %217, %221 : vector<8x32xf32>
      %223 = vector.extract_strided_slice %45 {offsets = [48, 0], sizes = [8, 128], strides = [1, 1]} : vector<64x128xf32> to vector<8x128xf32>
      %224 = arith.truncf %222 : vector<8x32xf32> to vector<8x32xbf16>
      %cst_62 = arith.constant dense<0.000000e+00> : vector<8x128xf32>
      %225 = tpu.matmul %224, %46, %cst_62 {dimension_numbers = #tpu.dot_dimension_numbers<[1], [0], [0], [1], [0, 0, 1, 1], [], []>} : vector<8x32xbf16>, vector<32x128xbf16>, vector<8x128xf32> -> vector<8x128xf32>
      %226 = arith.addf %223, %225 : vector<8x128xf32>
      %227 = vector.extract_strided_slice %226 {offsets = [0, 0], sizes = [8, 32], strides = [1, 1]} : vector<8x128xf32> to vector<8x32xf32>
      %228 = arith.negf %227 : vector<8x32xf32>
      %229 = math.exp %228 : vector<8x32xf32>
      %cst_63 = arith.constant 1.000000e+00 : f32
      %230 = vector.broadcast %cst_63 : f32 to vector<8x32xf32>
      %231 = arith.addf %230, %229 : vector<8x32xf32>
      %232 = arith.divf %230, %231 : vector<8x32xf32>
      %233 = vector.extract_strided_slice %226 {offsets = [0, 32], sizes = [8, 32], strides = [1, 1]} : vector<8x128xf32> to vector<8x32xf32>
      %234 = arith.negf %233 : vector<8x32xf32>
      %235 = math.exp %234 : vector<8x32xf32>
      %cst_64 = arith.constant 1.000000e+00 : f32
      %236 = vector.broadcast %cst_64 : f32 to vector<8x32xf32>
      %237 = arith.addf %236, %235 : vector<8x32xf32>
      %238 = arith.divf %236, %237 : vector<8x32xf32>
      %239 = vector.extract_strided_slice %226 {offsets = [0, 64], sizes = [8, 32], strides = [1, 1]} : vector<8x128xf32> to vector<8x32xf32>
      %240 = math.tanh %239 : vector<8x32xf32>
      %241 = vector.extract_strided_slice %226 {offsets = [0, 96], sizes = [8, 32], strides = [1, 1]} : vector<8x128xf32> to vector<8x32xf32>
      %242 = arith.negf %241 : vector<8x32xf32>
      %243 = math.exp %242 : vector<8x32xf32>
      %cst_65 = arith.constant 1.000000e+00 : f32
      %244 = vector.broadcast %cst_65 : f32 to vector<8x32xf32>
      %245 = arith.addf %244, %243 : vector<8x32xf32>
      %246 = arith.divf %244, %245 : vector<8x32xf32>
      %247 = arith.mulf %238, %220 : vector<8x32xf32>
      %248 = arith.mulf %232, %240 : vector<8x32xf32>
      %249 = arith.addf %247, %248 : vector<8x32xf32>
      %250 = math.tanh %249 : vector<8x32xf32>
      %251 = arith.mulf %246, %250 : vector<8x32xf32>
      %252 = vector.extract_strided_slice %45 {offsets = [56, 0], sizes = [8, 128], strides = [1, 1]} : vector<64x128xf32> to vector<8x128xf32>
      %253 = arith.truncf %251 : vector<8x32xf32> to vector<8x32xbf16>
      %cst_66 = arith.constant dense<0.000000e+00> : vector<8x128xf32>
      %254 = tpu.matmul %253, %46, %cst_66 {dimension_numbers = #tpu.dot_dimension_numbers<[1], [0], [0], [1], [0, 0, 1, 1], [], []>} : vector<8x32xbf16>, vector<32x128xbf16>, vector<8x128xf32> -> vector<8x128xf32>
      %255 = arith.addf %252, %254 : vector<8x128xf32>
      %256 = vector.extract_strided_slice %255 {offsets = [0, 0], sizes = [8, 32], strides = [1, 1]} : vector<8x128xf32> to vector<8x32xf32>
      %257 = arith.negf %256 : vector<8x32xf32>
      %258 = math.exp %257 : vector<8x32xf32>
      %cst_67 = arith.constant 1.000000e+00 : f32
      %259 = vector.broadcast %cst_67 : f32 to vector<8x32xf32>
      %260 = arith.addf %259, %258 : vector<8x32xf32>
      %261 = arith.divf %259, %260 : vector<8x32xf32>
      %262 = vector.extract_strided_slice %255 {offsets = [0, 32], sizes = [8, 32], strides = [1, 1]} : vector<8x128xf32> to vector<8x32xf32>
      %263 = arith.negf %262 : vector<8x32xf32>
      %264 = math.exp %263 : vector<8x32xf32>
      %cst_68 = arith.constant 1.000000e+00 : f32
      %265 = vector.broadcast %cst_68 : f32 to vector<8x32xf32>
      %266 = arith.addf %265, %264 : vector<8x32xf32>
      %267 = arith.divf %265, %266 : vector<8x32xf32>
      %268 = vector.extract_strided_slice %255 {offsets = [0, 64], sizes = [8, 32], strides = [1, 1]} : vector<8x128xf32> to vector<8x32xf32>
      %269 = math.tanh %268 : vector<8x32xf32>
      %270 = vector.extract_strided_slice %255 {offsets = [0, 96], sizes = [8, 32], strides = [1, 1]} : vector<8x128xf32> to vector<8x32xf32>
      %271 = arith.negf %270 : vector<8x32xf32>
      %272 = math.exp %271 : vector<8x32xf32>
      %cst_69 = arith.constant 1.000000e+00 : f32
      %273 = vector.broadcast %cst_69 : f32 to vector<8x32xf32>
      %274 = arith.addf %273, %272 : vector<8x32xf32>
      %275 = arith.divf %273, %274 : vector<8x32xf32>
      %276 = arith.mulf %267, %249 : vector<8x32xf32>
      %277 = arith.mulf %261, %269 : vector<8x32xf32>
      %278 = arith.addf %276, %277 : vector<8x32xf32>
      %279 = math.tanh %278 : vector<8x32xf32>
      %280 = arith.mulf %275, %279 : vector<8x32xf32>
      %281 = arith.addf %39, %280 : vector<8x32xf32>
      %282 = arith.truncf %281 : vector<8x32xf32> to vector<8x32xbf16>
      %c0_70 = arith.constant 0 : index
      %c0_71 = arith.constant 0 : index
      %283 = vector.load %arg8[%c0_70, %c0_71] : memref<32x32xbf16, #tpu.memory_space<vmem>>, vector<32x32xbf16>
      %cst_72 = arith.constant dense<0.000000e+00> : vector<8x32xf32>
      %284 = tpu.matmul %282, %283, %cst_72 {dimension_numbers = #tpu.dot_dimension_numbers<[1], [0], [0], [1], [0, 0, 1, 1], [], []>} : vector<8x32xbf16>, vector<32x32xbf16>, vector<8x32xf32> -> vector<8x32xf32>
      %c0_73 = arith.constant 0 : index
      %c0_74 = arith.constant 0 : index
      %285 = vector.load %arg9[%c0_73, %c0_74] : memref<1x32xf32, #tpu.memory_space<vmem>>, vector<1x32xf32>
      %286 = vector.broadcast %285 : vector<1x32xf32> to vector<8x32xf32>
      %287 = arith.addf %284, %286 : vector<8x32xf32>
      %cst_75 = arith.constant 0.000000e+00 : f32
      %288 = vector.broadcast %cst_75 : f32 to vector<8x32xf32>
      %289 = arith.maximumf %287, %288 : vector<8x32xf32>
      %290 = arith.truncf %289 : vector<8x32xf32> to vector<8x32xbf16>
      %c0_76 = arith.constant 0 : index
      %c0_77 = arith.constant 0 : index
      %291 = vector.load %arg13[%c0_76, %c0_77] : memref<8x32xbf16, #tpu.memory_space<vmem>>, vector<8x32xbf16>
      tpu.vector_store %arg13[%c0_76, %c0_77], %290 {strides = array<i32>} : memref<8x32xbf16, #tpu.memory_space<vmem>>, vector<8x32xbf16>,
      %cst_78 = arith.constant 0xFF800000 : f32
      %292 = vector.broadcast %cst_78 : f32 to vector<8x1xf32>
      %c0_79 = arith.constant 0 : index
      %c0_80 = arith.constant 0 : index
      %293 = vector.load %arg14[%c0_79, %c0_80] : memref<8x1xf32, #tpu.memory_space<vmem>>, vector<8x1xf32>
      tpu.vector_store %arg14[%c0_79, %c0_80], %292 {strides = array<i32>} : memref<8x1xf32, #tpu.memory_space<vmem>>, vector<8x1xf32>,
      %cst_81 = arith.constant 0.000000e+00 : f32
      %294 = vector.broadcast %cst_81 : f32 to vector<8x1xf32>
      %c0_82 = arith.constant 0 : index
      %c0_83 = arith.constant 0 : index
      %295 = vector.load %arg15[%c0_82, %c0_83] : memref<8x1xf32, #tpu.memory_space<vmem>>, vector<8x1xf32>
      tpu.vector_store %arg15[%c0_82, %c0_83], %294 {strides = array<i32>} : memref<8x1xf32, #tpu.memory_space<vmem>>, vector<8x1xf32>,
    } else {
    }
    %c0 = arith.constant 0 : index
    %c0_1 = arith.constant 0 : index
    %3 = vector.load %arg13[%c0, %c0_1] : memref<8x32xbf16, #tpu.memory_space<vmem>>, vector<8x32xbf16>
    %c0_2 = arith.constant 0 : index
    %c0_3 = arith.constant 0 : index
    %4 = vector.load %arg10[%c0_2, %c0_3] : memref<32x256xbf16, #tpu.memory_space<vmem>>, vector<32x256xbf16>
    %cst = arith.constant dense<0.000000e+00> : vector<8x256xf32>
    %5 = tpu.matmul %3, %4, %cst {dimension_numbers = #tpu.dot_dimension_numbers<[1], [0], [0], [1], [0, 0, 1, 1], [], []>} : vector<8x32xbf16>, vector<32x256xbf16>, vector<8x256xf32> -> vector<8x256xf32>
    %c0_4 = arith.constant 0 : index
    %c0_5 = arith.constant 0 : index
    %6 = vector.load %arg11[%c0_4, %c0_5] : memref<1x256xf32, #tpu.memory_space<vmem>>, vector<1x256xf32>
    %7 = vector.broadcast %6 : vector<1x256xf32> to vector<8x256xf32>
    %8 = arith.addf %5, %7 : vector<8x256xf32>
    %9 = arith.index_cast %arg0 : i32 to index
    %c0_6 = arith.constant 0 : index
    %c0_7 = arith.constant 0 : index
    %10 = vector.load %arg16[%9, %c0_6, %c0_7] : memref<4x8x256xf32, #tpu.memory_space<vmem>>, vector<1x8x256xf32>
    %11 = vector.shape_cast %10 : vector<1x8x256xf32> to vector<8x256xf32>
    %12 = vector.shape_cast %8 : vector<8x256xf32> to vector<1x8x256xf32>
    tpu.vector_store %arg16[%9, %c0_6, %c0_7], %12 {strides = array<i32>} : memref<4x8x256xf32, #tpu.memory_space<vmem>>, vector<1x8x256xf32>,
    %c0_8 = arith.constant 0 : index
    %c0_9 = arith.constant 0 : index
    %13 = vector.load %arg14[%c0_8, %c0_9] : memref<8x1xf32, #tpu.memory_space<vmem>>, vector<8x1xf32>
    %cst_10 = arith.constant dense<0xFF800000> : vector<8xf32>
    %14 = vector.multi_reduction <maximumf>, %8, %cst_10 [1] : vector<8x256xf32> to vector<8xf32>
    %15 = vector.shape_cast %14 : vector<8xf32> to vector<8x1xf32>
    %16 = arith.maximumf %13, %15 : vector<8x1xf32>
    %c0_11 = arith.constant 0 : index
    %c0_12 = arith.constant 0 : index
    %17 = vector.load %arg15[%c0_11, %c0_12] : memref<8x1xf32, #tpu.memory_space<vmem>>, vector<8x1xf32>
    %18 = arith.subf %13, %16 : vector<8x1xf32>
    %19 = math.exp %18 : vector<8x1xf32>
    %20 = arith.mulf %17, %19 : vector<8x1xf32>
    %21 = vector.broadcast %16 : vector<8x1xf32> to vector<8x256xf32>
    %22 = arith.subf %8, %21 : vector<8x256xf32>
    %23 = math.exp %22 : vector<8x256xf32>
    %cst_13 = arith.constant dense<0.000000e+00> : vector<8xf32>
    %24 = vector.multi_reduction <add>, %23, %cst_13 [1] : vector<8x256xf32> to vector<8xf32>
    %25 = vector.shape_cast %24 : vector<8xf32> to vector<8x1xf32>
    %26 = arith.addf %20, %25 : vector<8x1xf32>
    %c0_14 = arith.constant 0 : index
    %c0_15 = arith.constant 0 : index
    %27 = vector.load %arg15[%c0_14, %c0_15] : memref<8x1xf32, #tpu.memory_space<vmem>>, vector<8x1xf32>
    tpu.vector_store %arg15[%c0_14, %c0_15], %26 {strides = array<i32>} : memref<8x1xf32, #tpu.memory_space<vmem>>, vector<8x1xf32>,
    %c0_16 = arith.constant 0 : index
    %c0_17 = arith.constant 0 : index
    %28 = vector.load %arg14[%c0_16, %c0_17] : memref<8x1xf32, #tpu.memory_space<vmem>>, vector<8x1xf32>
    tpu.vector_store %arg14[%c0_16, %c0_17], %16 {strides = array<i32>} : memref<8x1xf32, #tpu.memory_space<vmem>>, vector<8x1xf32>,
    %c3_i32 = arith.constant 3 : i32
    %29 = arith.cmpi eq, %arg0, %c3_i32 : i32
    %30 = arith.extui %29 : i1 to i32
    %c0_i32_18 = arith.constant 0 : i32
    %31 = arith.cmpi ne, %30, %c0_i32_18 : i32
    scf.if %31 {
      %c0_19 = arith.constant 0 : index
      %c0_20 = arith.constant 0 : index
      %32 = vector.load %arg14[%c0_19, %c0_20] : memref<8x1xf32, #tpu.memory_space<vmem>>, vector<8x1xf32>
      %c0_21 = arith.constant 0 : index
      %c0_22 = arith.constant 0 : index
      %33 = vector.load %arg15[%c0_21, %c0_22] : memref<8x1xf32, #tpu.memory_space<vmem>>, vector<8x1xf32>
      %34 = math.log %33 : vector<8x1xf32>
      %35 = arith.addf %32, %34 : vector<8x1xf32>
      %c0_23 = arith.constant 0 : index
      %c0_24 = arith.constant 0 : index
      %c0_25 = arith.constant 0 : index
      %36 = vector.load %arg16[%c0_23, %c0_24, %c0_25] : memref<4x8x256xf32, #tpu.memory_space<vmem>>, vector<1x8x256xf32>
      %37 = vector.shape_cast %36 : vector<1x8x256xf32> to vector<8x256xf32>
      %38 = vector.broadcast %35 : vector<8x1xf32> to vector<8x256xf32>
      %39 = arith.subf %37, %38 : vector<8x256xf32>
      %c0_26 = arith.constant 0 : index
      %c0_27 = arith.constant 0 : index
      %40 = vector.load %arg12[%c0_26, %c0_27] : memref<8x1024xf32, #tpu.memory_space<vmem>>, vector<8x256xf32>
      tpu.vector_store %arg12[%c0_26, %c0_27], %39 {strides = array<i32>} : memref<8x1024xf32, #tpu.memory_space<vmem>>, vector<8x256xf32>,
      %c1 = arith.constant 1 : index
      %c0_28 = arith.constant 0 : index
      %c0_29 = arith.constant 0 : index
      %41 = vector.load %arg16[%c1, %c0_28, %c0_29] : memref<4x8x256xf32, #tpu.memory_space<vmem>>, vector<1x8x256xf32>
      %42 = vector.shape_cast %41 : vector<1x8x256xf32> to vector<8x256xf32>
      %43 = vector.broadcast %35 : vector<8x1xf32> to vector<8x256xf32>
      %44 = arith.subf %42, %43 : vector<8x256xf32>
      %c0_30 = arith.constant 0 : index
      %c256 = arith.constant 256 : index
      %45 = vector.load %arg12[%c0_30, %c256] : memref<8x1024xf32, #tpu.memory_space<vmem>>, vector<8x256xf32>
      tpu.vector_store %arg12[%c0_30, %c256], %44 {strides = array<i32>} : memref<8x1024xf32, #tpu.memory_space<vmem>>, vector<8x256xf32>,
      %c2 = arith.constant 2 : index
      %c0_31 = arith.constant 0 : index
      %c0_32 = arith.constant 0 : index
      %46 = vector.load %arg16[%c2, %c0_31, %c0_32] : memref<4x8x256xf32, #tpu.memory_space<vmem>>, vector<1x8x256xf32>
      %47 = vector.shape_cast %46 : vector<1x8x256xf32> to vector<8x256xf32>
      %48 = vector.broadcast %35 : vector<8x1xf32> to vector<8x256xf32>
      %49 = arith.subf %47, %48 : vector<8x256xf32>
      %c0_33 = arith.constant 0 : index
      %c512 = arith.constant 512 : index
      %50 = vector.load %arg12[%c0_33, %c512] : memref<8x1024xf32, #tpu.memory_space<vmem>>, vector<8x256xf32>
      tpu.vector_store %arg12[%c0_33, %c512], %49 {strides = array<i32>} : memref<8x1024xf32, #tpu.memory_space<vmem>>, vector<8x256xf32>,
      %c3 = arith.constant 3 : index
      %c0_34 = arith.constant 0 : index
      %c0_35 = arith.constant 0 : index
      %51 = vector.load %arg16[%c3, %c0_34, %c0_35] : memref<4x8x256xf32, #tpu.memory_space<vmem>>, vector<1x8x256xf32>
      %52 = vector.shape_cast %51 : vector<1x8x256xf32> to vector<8x256xf32>
      %53 = vector.broadcast %35 : vector<8x1xf32> to vector<8x256xf32>
      %54 = arith.subf %52, %53 : vector<8x256xf32>
      %c0_36 = arith.constant 0 : index
      %c768 = arith.constant 768 : index
      %55 = vector.load %arg12[%c0_36, %c768] : memref<8x1024xf32, #tpu.memory_space<vmem>>, vector<8x256xf32>
      tpu.vector_store %arg12[%c0_36, %c768], %54 {strides = array<i32>} : memref<8x1024xf32, #tpu.memory_space<vmem>>, vector<8x256xf32>,
    } else {
    }
    return
  }
  func.func @transform_0(%arg0: i32) -> (i32, i32) {
    %c0_i32 = arith.constant 0 : i32
    %c0_i32_0 = arith.constant 0 : i32
    %c0_i32_1 = arith.constant 0 : i32
    return %c0_i32, %c0_i32_0 : i32, i32
  }
  func.func @transform_1(%arg0: i32) -> (i32, i32) {
    %c0_i32 = arith.constant 0 : i32
    %c0_i32_0 = arith.constant 0 : i32
    %c0_i32_1 = arith.constant 0 : i32
    return %c0_i32, %c0_i32_0 : i32, i32
  }
  func.func @transform_2(%arg0: i32) -> (i32, i32) {
    %c0_i32 = arith.constant 0 : i32
    %c0_i32_0 = arith.constant 0 : i32
    %c0_i32_1 = arith.constant 0 : i32
    return %c0_i32, %c0_i32_0 : i32, i32
  }
  func.func @transform_3(%arg0: i32) -> (i32, i32) {
    %c0_i32 = arith.constant 0 : i32
    %c0_i32_0 = arith.constant 0 : i32
    %c0_i32_1 = arith.constant 0 : i32
    return %c0_i32, %c0_i32_0 : i32, i32
  }
  func.func @transform_4(%arg0: i32) -> (i32, i32) {
    %c0_i32 = arith.constant 0 : i32
    %c0_i32_0 = arith.constant 0 : i32
    %c0_i32_1 = arith.constant 0 : i32
    return %c0_i32, %c0_i32_0 : i32, i32
  }
  func.func @transform_5(%arg0: i32) -> (i32, i32) {
    %c0_i32 = arith.constant 0 : i32
    %c0_i32_0 = arith.constant 0 : i32
    %c0_i32_1 = arith.constant 0 : i32
    return %c0_i32, %c0_i32_0 : i32, i32
  }
  func.func @transform_6(%arg0: i32) -> (i32, i32) {
    %c0_i32 = arith.constant 0 : i32
    %c0_i32_0 = arith.constant 0 : i32
    %c0_i32_1 = arith.constant 0 : i32
    return %c0_i32, %c0_i32_0 : i32, i32
  }
  func.func @transform_7(%arg0: i32) -> (i32, i32) {
    %c0_i32 = arith.constant 0 : i32
    %c0_i32_0 = arith.constant 0 : i32
    %c0_i32_1 = arith.constant 0 : i32
    return %c0_i32, %c0_i32_0 : i32, i32
  }
  func.func @transform_8(%arg0: i32) -> (i32, i32) {
    %c0_i32 = arith.constant 0 : i32
    %c0_i32_0 = arith.constant 0 : i32
    %c0_i32_1 = arith.constant 0 : i32
    return %c0_i32, %c0_i32_0 : i32, i32
  }
  func.func @transform_9(%arg0: i32) -> (i32, i32) {
    %c0_i32 = arith.constant 0 : i32
    %c0_i32_0 = arith.constant 0 : i32
    return %c0_i32, %arg0 : i32, i32
  }
  func.func @transform_10(%arg0: i32) -> (i32, i32) {
    %c0_i32 = arith.constant 0 : i32
    %c0_i32_0 = arith.constant 0 : i32
    return %c0_i32, %arg0 : i32, i32
  }
  func.func @transform_11(%arg0: i32) -> (i32, i32) {
    %c0_i32 = arith.constant 0 : i32
    %c0_i32_0 = arith.constant 0 : i32
    %c0_i32_1 = arith.constant 0 : i32
    return %c0_i32, %c0_i32_0 : i32, i32
  }
}

</mosaic_0001>

<bundles_post_ra>
// kernel: tpu_custom_call.1
= control target key start
LH: loop header
LB: loop body
LE: loop exit
PB: predicated region body
PF: predicated region fallthrough
CT: control target
= control target key end

     0   :  { %16 = vsyncpa [#allocation8], 0  ;;  %s5488_s17 = smov 0   ;;  %s5490_s18 = smov 0   ;;  %s6503_s0 = inlined_call_operand.vmem [shape: bf16[8,4096], index: 0, kind: input, shape index: {}]   ;;  %s6504_s1 = inlined_call_operand.vmem [shape: bf16[64,32], index: 1, kind: input, shape index: {}]   ;;  %s6505_s2 = inlined_call_operand.vmem [shape: bf16[4096,32], index: 2, kind: input, shape index: {}]   ;;  %s6506_s3 = inlined_call_operand.vmem [shape: f32[1,32], index: 3, kind: input, shape index: {}]   ;;  %s6507_s4 = inlined_call_operand.vmem [shape: bf16[32,128], index: 4, kind: input, shape index: {}]   ;;  %s6508_s5 = inlined_call_operand.vmem [shape: bf16[32,128], index: 5, kind: input, shape index: {}]   ;;  %s6509_s6 = inlined_call_operand.vmem [shape: f32[1,128], index: 6, kind: input, shape index: {}]   ;;  %s6510_s7 = inlined_call_operand.vmem [shape: bf16[32,32], index: 7, kind: input, shape index: {}]   ;;  %s6511_s8 = inlined_call_operand.vmem [shape: f32[1,32], index: 8, kind: input, shape index: {}]   ;;  %s6512_s9 = inlined_call_operand.vmem [shape: bf16[32,1024], index: 9, kind: input, shape index: {}]   ;;  %s6513_s10 = inlined_call_operand.vmem [shape: f32[1,1024], index: 10, kind: input, shape index: {}]   ;;  %s6514_s11 = inlined_call_operand.hbm [shape: f32[8,1024], index: 11, kind: output, shape index: {}]  }
   0x1   :  { %s5492_s19 = smov 0  }
   0x2 LB: > { %s5504_s20 = sadd.s32 4294967295, %s5418_s19   ;;  %s5507_s21 = sadd.s32 1, %s5418_s19   ;;  %s5418_s19 = sphi %s5492_s19, %s6517_s19   ;;  %s5414_s18 = sphi %s5490_s18, %s6516_s18   ;;  %s5410_s17 = sphi %s5488_s17, %s6515_s17  }
   0x3   : > { %s215_s22 = ssub.s32 %s5418_s19, %s5507_s21  ;;  %s218_s23 = sadd.s32 1, %s5414_s18 }
   0x4   : > { %p216_p0 = scmp.eq.s32.totalorder %s215_s22, 0  ;;  %p225_p1 = scmp.ne.s32.totalorder %s5414_s18, %s5410_s17 }
   0x5   : > { %p226_p2 = scmp.eq.s32.totalorder %s5418_s19, 0  ;;  %p3860_p4 = scmp.ge.s32.totalorder %s5418_s19, 4 }
   0x6   : > { %s5516_s24 = scalar_select %p216_p0, %s5414_s18, %s218_s23  }
   0x7   : > { %p227_p3 = por %p226_p2, %p225_p1  ;;  %325 = sbr.rel (%p3860_p4) target bundleno = 20 (0x14), region = 52 }
   0xc   : > { %328 = sbr.rel (!%p227_p3) target bundleno = 20 (0x14), region = 56  ;;  %s330_s25 = sand.u32 (%p227_p3), 1, %s5414_s18  }
   0xd   : > { %s4977_s26 = sshll.u32 (%p227_p3), %s5418_s19, 3  ;;  %s3861_s27 = sshll.u32 (%p227_p3), %s330_s25, 5 }
   0xe   : > { %s335_s30 = scalar_lea.vmem (%p227_p3), %s6512_s9, %s4977_s26  ;;  %s332_s12 = scalar_lea.vmem (%p227_p3), [#allocation6], %s3861_s27 }
   0xf   : > { %v370_v0 = vld [vmem:[%s335_s30] sm:$0xff] (%p227_p3) }
  0x10   : > { %v372_v1 = vld [vmem:[%s335_s30 + $0x20] sm:$0xff] (%p227_p3)  ;;  %371 = vst [vmem:[%s332_s12] sm:$0xff] (%p227_p3), %v370_v0 }
  0x11   : > { %v374_v2 = vld [vmem:[%s335_s30 + $0x40] sm:$0xff]  ;;  %373 = vst [vmem:[%s332_s12 + $0x8] sm:$0xff] %v372_v1 }
  0x12   : > { %v376_v3 = vld [vmem:[%s335_s30 + $0x60] sm:$0xff]  ;;  %375 = vst [vmem:[%s332_s12 + $0x10] sm:$0xff] %v374_v2 }
  0x13   : > { %377 = vst [vmem:[%s332_s12 + $0x18] sm:$0xff] %v376_v3 }
  0x14 PF: > { %p3864_p5 = scmp.ge.s32.totalorder %s5418_s19, 1  ;;  %p390_p6 = scmp.lt.s32.totalorder %s5418_s19, 5 }
  0x16   : > { %p391_p7 = pnand %p3864_p5, %p390_p6 }
  0x17   : > { %s397_s13 = sand.u32 (!%p391_p7), 1, %s5410_s17   ;;  %s3866_s14 = sshll.u32 (!%p391_p7), %s5504_s20, 1 }
  0x18   : > { %394 = sbr.rel (%p391_p7) target bundleno = 5775 (0x168f), region = 98  ;;  %s3865_s15 = sshll.u32 (!%p391_p7), %s397_s13, 5 }
  0x19   : > { %p437_p8 = scmp.lt.s32.totalorder (!%p391_p7), %s3866_s14, 7  ;;  %s5534_s25 = scalar_lea.vmem (!%p391_p7), [#allocation6], %s3865_s15 }
  0x1a   : > { %p3867_p9 = scmp.ne.s32.totalorder (!%p391_p7), %s5504_s20, 0 }
  0x1d   : > { %s6519_s14 = smov (!%p437_p8, %s3866_s14), 7  ;;  %445 = sbr.rel (%p3867_p9) target bundleno = 5120 (0x1400), region = 106 }
  0x1e   : > { %s439_s23 = scalar_lea.vmem %s6513_s10, %s6519_s14  ;;  %s5421_s30 = smov (!%p3867_p9), 64  }
  0x1f   : > { %s5422_s12 = smov (!%p3867_p9), 32  }
  0x22   : > { %v4985_v4 = vld [vmem:[%s6505_s2 + $0x38] sm:$0xff]  ;;  %v4984_v8 = vld [vmem:[%s6505_s2 + $0x30] sm:$0xff]  ;;  %v4983_v12 = vld [vmem:[%s6505_s2 + $0x28] sm:$0xff]  ;;  %vm3091_vm0 = vcmask 261120  }
  0x23   : > { %v4993_v5 = vld [vmem:[%s6505_s2 + $0x78] sm:$0xff]  ;;  %2626 = vmatpush.bf16.msra.mxu0 %v4985_v4  ;;  %v4992_v9 = vld [vmem:[%s6505_s2 + $0x70] sm:$0xff]  ;;  %v4991_v13 = vld [vmem:[%s6505_s2 + $0x68] sm:$0xff] }
  0x24   : > { %v5001_v6 = vld [vmem:[%s6505_s2 + $0xb8] sm:$0xff]  ;;  %2639 = vmatpush.bf16.msra.mxu1 %v4993_v5  ;;  %v5000_v10 = vld [vmem:[%s6505_s2 + $0xb0] sm:$0xff]  ;;  %v4999_v14 = vld [vmem:[%s6505_s2 + $0xa8] sm:$0xff] }
  0x25   : > { %v5009_v7 = vld [vmem:[%s6505_s2 + $0xf8] sm:$0xff]  ;;  %2652 = vmatpush.bf16.msra.mxu2 %v5001_v6  ;;  %v5008_v11 = vld [vmem:[%s6505_s2 + $0xf0] sm:$0xff]  ;;  %v5007_v15 = vld [vmem:[%s6505_s2 + $0xe8] sm:$0xff] }
  0x26   : > { %2665 = vmatpush.bf16.msra.mxu3 %v5009_v7  ;;  %v4982_v16 = vld [vmem:[%s6505_s2 + $0x20] sm:$0xff]  ;;  %v4981_v20 = vld [vmem:[%s6505_s2 + $0x18] sm:$0xff]  ;;  %v4980_v24 = vld [vmem:[%s6505_s2 + $0x10] sm:$0xff] }
  0x27   : > { %2627 = vmatpush.bf16.msra.mxu0 %v4984_v8  ;;  %v4990_v17 = vld [vmem:[%s6505_s2 + $0x60] sm:$0xff]  ;;  %v4989_v21 = vld [vmem:[%s6505_s2 + $0x58] sm:$0xff]  ;;  %v4988_v25 = vld [vmem:[%s6505_s2 + $0x50] sm:$0xff] }
  0x28   : > { %2640 = vmatpush.bf16.msra.mxu1 %v4992_v9  ;;  %v4998_v18 = vld [vmem:[%s6505_s2 + $0xa0] sm:$0xff]  ;;  %v4997_v22 = vld [vmem:[%s6505_s2 + $0x98] sm:$0xff]  ;;  %v4996_v26 = vld [vmem:[%s6505_s2 + $0x90] sm:$0xff] }
  0x29   : > { %2653 = vmatpush.bf16.msra.mxu2 %v5000_v10  ;;  %v5006_v19 = vld [vmem:[%s6505_s2 + $0xe0] sm:$0xff]  ;;  %v5005_v23 = vld [vmem:[%s6505_s2 + $0xd8] sm:$0xff]  ;;  %v5004_v27 = vld [vmem:[%s6505_s2 + $0xd0] sm:$0xff] }
  0x2a   : > { %2666 = vmatpush.bf16.msra.mxu3 %v5008_v11  ;;  %v4979_v28 = vld [vmem:[%s6505_s2 + $0x8] sm:$0xff]  ;;  %v446_v30 = vld [vmem:[%s6503_s0] sm:$0xff]  ;;  %v5017_v39 = vld [vmem:[%s6505_s2 + $0x138] sm:$0xff] }
  0x2b   : > { %2628 = vmatpush.bf16.msra.mxu0 %v4983_v12  ;;  %v4987_v29 = vld [vmem:[%s6505_s2 + $0x48] sm:$0xff]  ;;  %v994_v34 = vunpack.c.l.b16 %v446_v30  ;;  %v4978_v35 = vld [vmem:[%s6505_s2] sm:$0xff]  ;;  %v995_v40 = vunpack.c.h.b16 %v446_v30  ;;  %v5025_v41 = vld [vmem:[%s6505_s2 + $0x178] sm:$0xff] }
  0x2c   : > { %2641 = vmatpush.bf16.msra.mxu1 %v4991_v13  ;;  %v4995_v31 = vld [vmem:[%s6505_s2 + $0x88] sm:$0xff]  ;;  %v4986_v36 = vld [vmem:[%s6505_s2 + $0x40] sm:$0xff]  ;;  %v5033_v42 = vld [vmem:[%s6505_s2 + $0x1b8] sm:$0xff] }
  0x2d   : > { %2654 = vmatpush.bf16.msra.mxu2 %v4999_v14  ;;  %v5003_v32 = vld [vmem:[%s6505_s2 + $0xc8] sm:$0xff]  ;;  %v4994_v38 = vld [vmem:[%s6505_s2 + $0x80] sm:$0xff]  ;;  %v1026_v44 = vpack.c.b16 %v994_v34, %v994_v34  ;;  %v5041_v46 = vld [vmem:[%s6505_s2 + $0x1f8] sm:$0xff]  ;;  %v1027_v49 = vpack.c.b16 %v995_v40, %v995_v40 }
  0x2e   : > { %2667 = vmatpush.bf16.msra.mxu3 %v5007_v15  ;;  %v447_v33 = vld [vmem:[%s6503_s0 + $0x8] sm:$0xff]  ;;  %v5002_v43 = vld [vmem:[%s6505_s2 + $0xc0] sm:$0xff]  ;;  %v5016_v48 = vld [vmem:[%s6505_s2 + $0x130] sm:$0xff] }
  0x2f   : > { %2629 = vmatpush.bf16.msra.mxu0 %v4982_v16  ;;  %v996_v37 = vunpack.c.l.b16 %v447_v33  ;;  %v997_v45 = vunpack.c.h.b16 %v447_v33  ;;  %v5024_v50 = vld [vmem:[%s6505_s2 + $0x170] sm:$0xff]  ;;  %v5015_v54 = vld [vmem:[%s6505_s2 + $0x128] sm:$0xff]  ;;  %v5014_v58 = vld [vmem:[%s6505_s2 + $0x120] sm:$0xff] }
  0x30   : > { %2642 = vmatpush.bf16.msra.mxu1 %v4990_v17  ;;  %v5032_v51 = vld [vmem:[%s6505_s2 + $0x1b0] sm:$0xff]  ;;  %v5023_v55 = vld [vmem:[%s6505_s2 + $0x168] sm:$0xff]  ;;  %v5022_v59 = vld [vmem:[%s6505_s2 + $0x160] sm:$0xff] }
  0x31   : > { %2655 = vmatpush.bf16.msra.mxu2 %v4998_v18  ;;  %v1028_v47 = vpack.c.b16 %v996_v37, %v996_v37  ;;  %v1029_v52 = vpack.c.b16 %v997_v45, %v997_v45  ;;  %v5040_v53 = vld [vmem:[%s6505_s2 + $0x1f0] sm:$0xff]  ;;  %v5031_v56 = vld [vmem:[%s6505_s2 + $0x1a8] sm:$0xff]  ;;  %v5030_v60 = vld [vmem:[%s6505_s2 + $0x1a0] sm:$0xff] }
  0x32   : > { %2668 = vmatpush.bf16.msra.mxu3 %v5006_v19  ;;  %v5039_v57 = vld [vmem:[%s6505_s2 + $0x1e8] sm:$0xff]  ;;  %v5038_v61 = vld [vmem:[%s6505_s2 + $0x1e0] sm:$0xff]  ;;  %v5013_v62 = vld [vmem:[%s6505_s2 + $0x118] sm:$0xff] }
  0x33   : > { %2630 = vmatpush.bf16.msra.mxu0 %v4981_v20  ;;  %v5021_v63 = vld [vmem:[%s6505_s2 + $0x158] sm:$0xff]  ;;  %v5012_v2 = vld [vmem:[%s6505_s2 + $0x110] sm:$0xff]  ;;  %v5011_v6 = vld [vmem:[%s6505_s2 + $0x108] sm:$0xff] }
  0x34   : > { %2643 = vmatpush.bf16.msra.mxu1 %v4989_v21  ;;  %v5029_v0 = vld [vmem:[%s6505_s2 + $0x198] sm:$0xff]  ;;  %v5020_v3 = vld [vmem:[%s6505_s2 + $0x150] sm:$0xff]  ;;  %v5019_v7 = vld [vmem:[%s6505_s2 + $0x148] sm:$0xff] }
  0x35   : > { %2656 = vmatpush.bf16.msra.mxu2 %v4997_v22  ;;  %v5037_v1 = vld [vmem:[%s6505_s2 + $0x1d8] sm:$0xff]  ;;  %v5028_v4 = vld [vmem:[%s6505_s2 + $0x190] sm:$0xff]  ;;  %v5027_v8 = vld [vmem:[%s6505_s2 + $0x188] sm:$0xff] }
  0x36   : > { %2669 = vmatpush.bf16.msra.mxu3 %v5005_v23  ;;  %v5036_v5 = vld [vmem:[%s6505_s2 + $0x1d0] sm:$0xff]  ;;  %v449_v9 = vld [vmem:[%s6503_s0 + $0x18] sm:$0xff]  ;;  %v5035_v11 = vld [vmem:[%s6505_s2 + $0x1c8] sm:$0xff] }
  0x37   : > { %2631 = vmatpush.bf16.msra.mxu0 %v4980_v24  ;;  %v448_v10 = vld [vmem:[%s6503_s0 + $0x10] sm:$0xff]  ;;  %v5010_v12 = vld [vmem:[%s6505_s2 + $0x100] sm:$0xff]  ;;  %v1000_v13 = vunpack.c.l.b16 %v449_v9  ;;  %v5049_v18 = vld [vmem:[%s6505_s2 + $0x238] sm:$0xff]  ;;  %v1001_v22 = vunpack.c.h.b16 %v449_v9 }
  0x38   : > { %2644 = vmatpush.bf16.msra.mxu1 %v4988_v25  ;;  %v5018_v14 = vld [vmem:[%s6505_s2 + $0x140] sm:$0xff]  ;;  %v998_v16 = vunpack.c.l.b16 %v448_v10  ;;  %v999_v17 = vunpack.c.h.b16 %v448_v10  ;;  %v5057_v19 = vld [vmem:[%s6505_s2 + $0x278] sm:$0xff]  ;;  %v5055_v33 = vld [vmem:[%s6505_s2 + $0x268] sm:$0xff] }
  0x39   : > { %2657 = vmatpush.bf16.msra.mxu2 %v4996_v26  ;;  %v5026_v15 = vld [vmem:[%s6505_s2 + $0x180] sm:$0xff]  ;;  %v5065_v20 = vld [vmem:[%s6505_s2 + $0x2b8] sm:$0xff]  ;;  %v1032_v24 = vpack.c.b16 %v1000_v13, %v1000_v13  ;;  %v1033_v30 = vpack.c.b16 %v1001_v22, %v1001_v22  ;;  %v5063_v34 = vld [vmem:[%s6505_s2 + $0x2a8] sm:$0xff] }
  0x3a   : > { %2670 = vmatpush.bf16.msra.mxu3 %v5004_v27  ;;  %v5034_v21 = vld [vmem:[%s6505_s2 + $0x1c0] sm:$0xff]  ;;  %v5073_v23 = vld [vmem:[%s6505_s2 + $0x2f8] sm:$0xff]  ;;  %v1030_v25 = vpack.c.b16 %v998_v16, %v998_v16  ;;  %v1031_v26 = vpack.c.b16 %v999_v17, %v999_v17  ;;  %v5048_v27 = vld [vmem:[%s6505_s2 + $0x230] sm:$0xff] }
  0x3b   : > { %2632 = vmatpush.bf16.msra.mxu0 %v4979_v28  ;;  %v5056_v28 = vld [vmem:[%s6505_s2 + $0x270] sm:$0xff]  ;;  %v5054_v37 = vld [vmem:[%s6505_s2 + $0x260] sm:$0xff]  ;;  %v5045_v40 = vld [vmem:[%s6505_s2 + $0x218] sm:$0xff] }
  0x3c   : > { %2645 = vmatpush.bf16.msra.mxu1 %v4987_v29  ;;  %v5064_v29 = vld [vmem:[%s6505_s2 + $0x2b0] sm:$0xff]  ;;  %v5079_v10 = vld [vmem:[%s6505_s2 + $0x328] sm:$0xff]  ;;  %v5094_v16 = vld [vmem:[%s6505_s2 + $0x3a0] sm:$0xff] }
  0x3d   : > { %2658 = vmatpush.bf16.msra.mxu2 %v4995_v31  ;;  %v5072_v31 = vld [vmem:[%s6505_s2 + $0x2f0] sm:$0xff]  ;;  %v5103_v13 = vld [vmem:[%s6505_s2 + $0x3e8] sm:$0xff]  ;;  %v5102_v17 = vld [vmem:[%s6505_s2 + $0x3e0] sm:$0xff] }
  0x3e   : > { %2671 = vmatpush.bf16.msra.mxu3 %v5003_v32  ;;  %v5047_v32 = vld [vmem:[%s6505_s2 + $0x228] sm:$0xff]  ;;  %v5052_v45 = vld [vmem:[%s6505_s2 + $0x250] sm:$0xff] }
  0x3f   : > { %2633 = vmatpush.bf16.msra.mxu0 %v4978_v35  ;;  %v5071_v35 = vld [vmem:[%s6505_s2 + $0x2e8] sm:$0xff]  ;;  %v5104_v9 = vld [vmem:[%s6505_s2 + $0x3f0] sm:$0xff] }
  0x40   : > { %2646 = vmatpush.bf16.msra.mxu1 %v4986_v36  ;;  %v5046_v36 = vld [vmem:[%s6505_s2 + $0x220] sm:$0xff]  ;;  %v5076_v22 = vld [vmem:[%s6505_s2 + $0x310] sm:$0xff] }
  0x41   : > { %2659 = vmatpush.bf16.msra.mxu2 %v4994_v38  ;;  %v5062_v38 = vld [vmem:[%s6505_s2 + $0x2a0] sm:$0xff] }
  0x42   : > { %2672 = vmatpush.bf16.msra.mxu3 %v5002_v43  ;;  %2634 = vmatmul.bf16.vlgmr.msra.gmra.mxu0 %v1026_v44  ;;  %v5069_v43 = vld [vmem:[%s6505_s2 + $0x2d8] sm:$0xff]  ;;  %v5044_v44 = vld [vmem:[%s6505_s2 + $0x210] sm:$0xff] }
  0x43   : > { %2678 = vmatpush.bf16.msrb.mxu0 %v5017_v39  ;;  %2647 = vmatmul.bf16.vlgmr.msra.gmra.mxu1 %v1027_v49  ;;  %v5070_v39 = vld [vmem:[%s6505_s2 + $0x2e0] sm:$0xff]  ;;  %v5051_v49 = vld [vmem:[%s6505_s2 + $0x248] sm:$0xff] }
  0x44   : > { %2691 = vmatpush.bf16.msrb.mxu1 %v5025_v41  ;;  %2660 = vmatmul.bf16.vlgmr.msra.gmra.mxu2 %v1028_v47  ;;  %v5053_v41 = vld [vmem:[%s6505_s2 + $0x258] sm:$0xff]  ;;  %v5068_v47 = vld [vmem:[%s6505_s2 + $0x2d0] sm:$0xff] }
  0x45   : > { %2704 = vmatpush.bf16.msrb.mxu2 %v5033_v42  ;;  %2673 = vmatmul.bf16.vlgmr.msra.gmra.mxu3 %v1029_v52  ;;  %v5061_v42 = vld [vmem:[%s6505_s2 + $0x298] sm:$0xff]  ;;  %v451_v52 = vld [vmem:[%s6503_s0 + $0x28] sm:$0xff] }
  0x46   : > { %2717 = vmatpush.bf16.msrb.mxu3 %v5041_v46  ;;  %v5060_v46 = vld [vmem:[%s6505_s2 + $0x290] sm:$0xff] }
  0x47   : > { %2679 = vmatpush.bf16.msrb.mxu0 %v5016_v48  ;;  %v5043_v48 = vld [vmem:[%s6505_s2 + $0x208] sm:$0xff] }
  0x48   : > { %2692 = vmatpush.bf16.msrb.mxu1 %v5024_v50  ;;  %v450_v50 = vld [vmem:[%s6503_s0 + $0x20] sm:$0xff] }
  0x49   : > { %2705 = vmatpush.bf16.msrb.mxu2 %v5032_v51  ;;  %v5059_v51 = vld [vmem:[%s6505_s2 + $0x288] sm:$0xff] }
  0x4a   : > { %2718 = vmatpush.bf16.msrb.mxu3 %v5040_v53  ;;  %v5067_v53 = vld [vmem:[%s6505_s2 + $0x2c8] sm:$0xff] }
  0x4b   : > { %2680 = vmatpush.bf16.msrb.mxu0 %v5015_v54  ;;  %v1002_v54 = vunpack.c.l.b16 %v450_v50 }
  0x4c   : > { %2693 = vmatpush.bf16.msrb.mxu1 %v5023_v55  ;;  %v5042_v55 = vld [vmem:[%s6505_s2 + $0x200] sm:$0xff] }
  0x4d   : > { %2706 = vmatpush.bf16.msrb.mxu2 %v5031_v56  ;;  %v5050_v56 = vld [vmem:[%s6505_s2 + $0x240] sm:$0xff] }
  0x4e   : > { %2719 = vmatpush.bf16.msrb.mxu3 %v5039_v57  ;;  %v1004_v57 = vunpack.c.l.b16 %v451_v52 }
  0x4f   : > { %2681 = vmatpush.bf16.msrb.mxu0 %v5014_v58  ;;  %v5058_v58 = vld [vmem:[%s6505_s2 + $0x280] sm:$0xff] }
  0x50   : > { %2694 = vmatpush.bf16.msrb.mxu1 %v5022_v59  ;;  %v5081_v59 = vld [vmem:[%s6505_s2 + $0x338] sm:$0xff] }
  0x51   : > { %2707 = vmatpush.bf16.msrb.mxu2 %v5030_v60  ;;  %v1003_v60 = vunpack.c.h.b16 %v450_v50  ;;  %v5128_v50 = vld [vmem:[%s6505_s2 + $0x4b0] sm:$0xff] }
  0x52   : > { %2720 = vmatpush.bf16.msrb.mxu3 %v5038_v61  ;;  %v5089_v61 = vld [vmem:[%s6505_s2 + $0x378] sm:$0xff] }
  0x53   : > { %2682 = vmatpush.bf16.msrb.mxu0 %v5013_v62  ;;  %v5097_v62 = vld [vmem:[%s6505_s2 + $0x3b8] sm:$0xff] }
  0x54   : > { %2695 = vmatpush.bf16.msrb.mxu1 %v5021_v63  ;;  %v1005_v63 = vunpack.c.h.b16 %v451_v52  ;;  %v5111_v52 = vld [vmem:[%s6505_s2 + $0x428] sm:$0xff] }
  0x55   : > { %2708 = vmatpush.bf16.msrb.mxu2 %v5029_v0  ;;  %v5066_v0 = vld [vmem:[%s6505_s2 + $0x2c0] sm:$0xff] }
  0x56   : > { %2721 = vmatpush.bf16.msrb.mxu3 %v5037_v1  ;;  %v1034_v1 = vpack.c.b16 %v1002_v54, %v1002_v54  ;;  %v5127_v54 = vld [vmem:[%s6505_s2 + $0x4a8] sm:$0xff] }
  0x57   : > { %2683 = vmatpush.bf16.msrb.mxu0 %v5012_v2  ;;  %v1036_v2 = vpack.c.b16 %v1004_v57, %v1004_v57  ;;  %v5118_v57 = vld [vmem:[%s6505_s2 + $0x460] sm:$0xff] }
  0x58   : > { %2696 = vmatpush.bf16.msrb.mxu1 %v5020_v3  ;;  %v5105_v3 = vld [vmem:[%s6505_s2 + $0x3f8] sm:$0xff] }
  0x59   : > { %2709 = vmatpush.bf16.msrb.mxu2 %v5028_v4  ;;  %v1035_v4 = vpack.c.b16 %v1003_v60, %v1003_v60  ;;  %v5109_v60 = vld [vmem:[%s6505_s2 + $0x418] sm:$0xff] }
  0x5a   : > { %2722 = vmatpush.bf16.msrb.mxu3 %v5036_v5  ;;  %v5080_v5 = vld [vmem:[%s6505_s2 + $0x330] sm:$0xff] }
  0x5b   : > { %2684 = vmatpush.bf16.msrb.mxu0 %v5011_v6  ;;  %v1037_v6 = vpack.c.b16 %v1005_v63, %v1005_v63  ;;  %v5133_v63 = vld [vmem:[%s6505_s2 + $0x4d8] sm:$0xff] }
  0x5c   : > { %2697 = vmatpush.bf16.msrb.mxu1 %v5019_v7  ;;  %v5088_v7 = vld [vmem:[%s6505_s2 + $0x370] sm:$0xff] }
  0x5d   : > { %2710 = vmatpush.bf16.msrb.mxu2 %v5027_v8  ;;  %v5096_v8 = vld [vmem:[%s6505_s2 + $0x3b0] sm:$0xff] }
  0x5e   : > { %2723 = vmatpush.bf16.msrb.mxu3 %v5035_v11  ;;  %v5087_v11 = vld [vmem:[%s6505_s2 + $0x368] sm:$0xff] }
  0x5f   : > { %2685 = vmatpush.bf16.msrb.mxu0 %v5010_v12  ;;  %v5095_v12 = vld [vmem:[%s6505_s2 + $0x3a8] sm:$0xff] }
  0x60   : > { %2698 = vmatpush.bf16.msrb.mxu1 %v5018_v14  ;;  %v5078_v14 = vld [vmem:[%s6505_s2 + $0x320] sm:$0xff] }
  0x61   : > { %2711 = vmatpush.bf16.msrb.mxu2 %v5026_v15  ;;  %v5086_v15 = vld [vmem:[%s6505_s2 + $0x360] sm:$0xff] }
  0x62   : > { %2724 = vmatpush.bf16.msrb.mxu3 %v5034_v21  ;;  %2686 = vmatmul.bf16.vlgmr.msrb.gmra.mxu0 %v1030_v25  ;;  %v5101_v21 = vld [vmem:[%s6505_s2 + $0x3d8] sm:$0xff]  ;;  %v5100_v25 = vld [vmem:[%s6505_s2 + $0x3d0] sm:$0xff] }
  0x63   : > { %2730 = vmatpush.bf16.msra.mxu0 %v5049_v18  ;;  %2699 = vmatmul.bf16.vlgmr.msrb.gmra.mxu1 %v1031_v26  ;;  %v5077_v18 = vld [vmem:[%s6505_s2 + $0x318] sm:$0xff]  ;;  %v5075_v26 = vld [vmem:[%s6505_s2 + $0x308] sm:$0xff] }
  0x64   : > { %2743 = vmatpush.bf16.msra.mxu1 %v5057_v19  ;;  %2712 = vmatmul.bf16.vlgmr.msrb.gmra.mxu2 %v1032_v24  ;;  %v5085_v19 = vld [vmem:[%s6505_s2 + $0x358] sm:$0xff]  ;;  %v5092_v24 = vld [vmem:[%s6505_s2 + $0x390] sm:$0xff] }
  0x65   : > { %2756 = vmatpush.bf16.msra.mxu2 %v5065_v20  ;;  %2725 = vmatmul.bf16.vlgmr.msrb.gmra.mxu3 %v1033_v30  ;;  %v5093_v20 = vld [vmem:[%s6505_s2 + $0x398] sm:$0xff] }
  0x66   : > { %2769 = vmatpush.bf16.msra.mxu3 %v5073_v23  ;;  %v5084_v23 = vld [vmem:[%s6505_s2 + $0x350] sm:$0xff]  ;;  %v453_v30 = vld [vmem:[%s6503_s0 + $0x38] sm:$0xff] }
  0x67   : > { %2731 = vmatpush.bf16.msra.mxu0 %v5048_v27  ;;  %v5083_v27 = vld [vmem:[%s6505_s2 + $0x348] sm:$0xff] }
  0x68   : > { %2744 = vmatpush.bf16.msra.mxu1 %v5056_v28  ;;  %v452_v28 = vld [vmem:[%s6503_s0 + $0x30] sm:$0xff] }
  0x69   : > { %2757 = vmatpush.bf16.msra.mxu2 %v5064_v29  ;;  %v5091_v29 = vld [vmem:[%s6505_s2 + $0x388] sm:$0xff] }
  0x6a   : > { %2770 = vmatpush.bf16.msra.mxu3 %v5072_v31  ;;  %v5099_v31 = vld [vmem:[%s6505_s2 + $0x3c8] sm:$0xff] }
  0x6b   : > { %2732 = vmatpush.bf16.msra.mxu0 %v5047_v32  ;;  %v5074_v32 = vld [vmem:[%s6505_s2 + $0x300] sm:$0xff] }
  0x6c   : > { %2745 = vmatpush.bf16.msra.mxu1 %v5055_v33  ;;  %v1006_v33 = vunpack.c.l.b16 %v452_v28 }
  0x6d   : > { %2758 = vmatpush.bf16.msra.mxu2 %v5063_v34  ;;  %v5082_v34 = vld [vmem:[%s6505_s2 + $0x340] sm:$0xff] }
  0x6e   : > { %2771 = vmatpush.bf16.msra.mxu3 %v5071_v35  ;;  %v5113_v35 = vld [vmem:[%s6505_s2 + $0x438] sm:$0xff] }
  0x6f   : > { %2733 = vmatpush.bf16.msra.mxu0 %v5046_v36  ;;  %v1008_v36 = vunpack.c.l.b16 %v453_v30 }
  0x70   : > { %2746 = vmatpush.bf16.msra.mxu1 %v5054_v37  ;;  %v1007_v37 = vunpack.c.h.b16 %v452_v28  ;;  %v5160_v28 = vld [vmem:[%s6505_s2 + $0x5b0] sm:$0xff] }
  0x71   : > { %2759 = vmatpush.bf16.msra.mxu2 %v5062_v38  ;;  %v5090_v38 = vld [vmem:[%s6505_s2 + $0x380] sm:$0xff] }
  0x72   : > { %2772 = vmatpush.bf16.msra.mxu3 %v5070_v39  ;;  %v5121_v39 = vld [vmem:[%s6505_s2 + $0x478] sm:$0xff] }
  0x73   : > { %2734 = vmatpush.bf16.msra.mxu0 %v5045_v40  ;;  %v1009_v40 = vunpack.c.h.b16 %v453_v30  ;;  %v5143_v30 = vld [vmem:[%s6505_s2 + $0x528] sm:$0xff] }
  0x74   : > { %2747 = vmatpush.bf16.msra.mxu1 %v5053_v41  ;;  %v5129_v41 = vld [vmem:[%s6505_s2 + $0x4b8] sm:$0xff] }
  0x75   : > { %2760 = vmatpush.bf16.msra.mxu2 %v5061_v42  ;;  %v5098_v42 = vld [vmem:[%s6505_s2 + $0x3c0] sm:$0xff] }
  0x76   : > { %2773 = vmatpush.bf16.msra.mxu3 %v5069_v43  ;;  %v1038_v43 = vpack.c.b16 %v1006_v33, %v1006_v33  ;;  %v5287_v33 = vld [vmem:[%s6506_s3] ss:$0 sm:$0xff] }
  0x77   : > { %2735 = vmatpush.bf16.msra.mxu0 %v5044_v44  ;;  %v5137_v44 = vld [vmem:[%s6505_s2 + $0x4f8] sm:$0xff] }
  0x78   : > { %2748 = vmatpush.bf16.msra.mxu1 %v5052_v45  ;;  %v1040_v45 = vpack.c.b16 %v1008_v36, %v1008_v36 }
  0x79   : > { %2761 = vmatpush.bf16.msra.mxu2 %v5060_v46  ;;  %v1039_v46 = vpack.c.b16 %v1007_v37, %v1007_v37  ;;  %v5150_v37 = vld [vmem:[%s6505_s2 + $0x560] sm:$0xff] }
  0x7a   : > { %2774 = vmatpush.bf16.msra.mxu3 %v5068_v47  ;;  %v1041_v47 = vpack.c.b16 %v1009_v40, %v1009_v40 }
  0x7b   : > { %2736 = vmatpush.bf16.msra.mxu0 %v5043_v48  ;;  %v5112_v48 = vld [vmem:[%s6505_s2 + $0x430] sm:$0xff] }
  0x7c   : > { %2749 = vmatpush.bf16.msra.mxu1 %v5051_v49  ;;  %v5120_v49 = vld [vmem:[%s6505_s2 + $0x470] sm:$0xff] }
  0x7d   : > { %2762 = vmatpush.bf16.msra.mxu2 %v5059_v51  ;;  %v5136_v51 = vld [vmem:[%s6505_s2 + $0x4f0] sm:$0xff] }
  0x7e   : > { %2775 = vmatpush.bf16.msra.mxu3 %v5067_v53  ;;  %v5119_v53 = vld [vmem:[%s6505_s2 + $0x468] sm:$0xff] }
  0x7f   : > { %2737 = vmatpush.bf16.msra.mxu0 %v5042_v55  ;;  %v5135_v55 = vld [vmem:[%s6505_s2 + $0x4e8] sm:$0xff] }
  0x80   : > { %2750 = vmatpush.bf16.msra.mxu1 %v5050_v56  ;;  %v5110_v56 = vld [vmem:[%s6505_s2 + $0x420] sm:$0xff] }
  0x81   : > { %2763 = vmatpush.bf16.msra.mxu2 %v5058_v58  ;;  %v5126_v58 = vld [vmem:[%s6505_s2 + $0x4a0] sm:$0xff] }
  0x82   : > { %2776 = vmatpush.bf16.msra.mxu3 %v5066_v0  ;;  %2738 = vmatmul.bf16.vlgmr.msra.gmra.mxu0 %v1034_v1  ;;  %v5108_v0 = vld [vmem:[%s6505_s2 + $0x410] sm:$0xff] }
  0x83   : > { %2782 = vmatpush.bf16.msrb.mxu0 %v5081_v59  ;;  %2751 = vmatmul.bf16.vlgmr.msra.gmra.mxu1 %v1035_v4  ;;  %v5134_v59 = vld [vmem:[%s6505_s2 + $0x4e0] sm:$0xff]  ;;  %v5116_v1 = vld [vmem:[%s6505_s2 + $0x450] sm:$0xff]  ;;  %v5107_v4 = vld [vmem:[%s6505_s2 + $0x408] sm:$0xff] }
  0x84   : > { %2795 = vmatpush.bf16.msrb.mxu1 %v5089_v61  ;;  %2764 = vmatmul.bf16.vlgmr.msra.gmra.mxu2 %v1036_v2  ;;  %v5117_v61 = vld [vmem:[%s6505_s2 + $0x458] sm:$0xff]  ;;  %v5124_v2 = vld [vmem:[%s6505_s2 + $0x490] sm:$0xff] }
  0x85   : > { %2808 = vmatpush.bf16.msrb.mxu2 %v5097_v62  ;;  %2777 = vmatmul.bf16.vlgmr.msra.gmra.mxu3 %v1037_v6  ;;  %v5125_v62 = vld [vmem:[%s6505_s2 + $0x498] sm:$0xff]  ;;  %v5123_v6 = vld [vmem:[%s6505_s2 + $0x488] sm:$0xff] }
  0x86   : > { %2821 = vmatpush.bf16.msrb.mxu3 %v5105_v3  ;;  %v5132_v3 = vld [vmem:[%s6505_s2 + $0x4d0] sm:$0xff] }
  0x87   : > { %2783 = vmatpush.bf16.msrb.mxu0 %v5080_v5  ;;  %v5115_v5 = vld [vmem:[%s6505_s2 + $0x448] sm:$0xff] }
  0x88   : > { %2796 = vmatpush.bf16.msrb.mxu1 %v5088_v7  ;;  %v454_v7 = vld [vmem:[%s6503_s0 + $0x40] sm:$0xff] }
  0x89   : > { %2809 = vmatpush.bf16.msrb.mxu2 %v5096_v8  ;;  %v455_v8 = vld [vmem:[%s6503_s0 + $0x48] sm:$0xff] }
  0x8a   : > { %2822 = vmatpush.bf16.msrb.mxu3 %v5104_v9  ;;  %v5131_v9 = vld [vmem:[%s6505_s2 + $0x4c8] sm:$0xff] }
  0x8b   : > { %2784 = vmatpush.bf16.msrb.mxu0 %v5079_v10  ;;  %v5106_v10 = vld [vmem:[%s6505_s2 + $0x400] sm:$0xff] }
  0x8c   : > { %2797 = vmatpush.bf16.msrb.mxu1 %v5087_v11  ;;  %v1010_v11 = vunpack.c.l.b16 %v454_v7 }
  0x8d   : > { %2810 = vmatpush.bf16.msrb.mxu2 %v5095_v12  ;;  %v1012_v12 = vunpack.c.l.b16 %v455_v8 }
  0x8e   : > { %2823 = vmatpush.bf16.msrb.mxu3 %v5103_v13  ;;  %v5114_v13 = vld [vmem:[%s6505_s2 + $0x440] sm:$0xff] }
  0x8f   : > { %2785 = vmatpush.bf16.msrb.mxu0 %v5078_v14  ;;  %v5122_v14 = vld [vmem:[%s6505_s2 + $0x480] sm:$0xff] }
  0x90   : > { %2798 = vmatpush.bf16.msrb.mxu1 %v5086_v15  ;;  %v1011_v15 = vunpack.c.h.b16 %v454_v7  ;;  %v5185_v7 = vld [vmem:[%s6505_s2 + $0x678] sm:$0xff] }
  0x91   : > { %2811 = vmatpush.bf16.msrb.mxu2 %v5094_v16  ;;  %v5145_v16 = vld [vmem:[%s6505_s2 + $0x538] sm:$0xff] }
  0x92   : > { %2824 = vmatpush.bf16.msrb.mxu3 %v5102_v17  ;;  %v5153_v17 = vld [vmem:[%s6505_s2 + $0x578] sm:$0xff] }
  0x93   : > { %2786 = vmatpush.bf16.msrb.mxu0 %v5077_v18  ;;  %v1013_v18 = vunpack.c.h.b16 %v455_v8 }
  0x94   : > { %2799 = vmatpush.bf16.msrb.mxu1 %v5085_v19  ;;  %v5161_v19 = vld [vmem:[%s6505_s2 + $0x5b8] sm:$0xff] }
  0x95   : > { %2812 = vmatpush.bf16.msrb.mxu2 %v5093_v20  ;;  %v5130_v20 = vld [vmem:[%s6505_s2 + $0x4c0] sm:$0xff] }
  0x96   : > { %2825 = vmatpush.bf16.msrb.mxu3 %v5101_v21  ;;  %v1042_v21 = vpack.c.b16 %v1010_v11, %v1010_v11  ;;  %v5162_v11 = vld [vmem:[%s6505_s2 + $0x5c0] sm:$0xff] }
  0x97   : > { %2787 = vmatpush.bf16.msrb.mxu0 %v5076_v22  ;;  %v1044_v22 = vpack.c.b16 %v1012_v12, %v1012_v12 }
  0x98   : > { %2800 = vmatpush.bf16.msrb.mxu1 %v5084_v23  ;;  %v5169_v23 = vld [vmem:[%s6505_s2 + $0x5f8] sm:$0xff] }
  0x99   : > { %2813 = vmatpush.bf16.msrb.mxu2 %v5092_v24  ;;  %v1043_v24 = vpack.c.b16 %v1011_v15, %v1011_v15 }
  0x9a   : > { %2826 = vmatpush.bf16.msrb.mxu3 %v5100_v25  ;;  %v1045_v25 = vpack.c.b16 %v1013_v18, %v1013_v18  ;;  %v5184_v18 = vld [vmem:[%s6505_s2 + $0x670] sm:$0xff] }
  0x9b   : > { %2788 = vmatpush.bf16.msrb.mxu0 %v5075_v26  ;;  %v5144_v26 = vld [vmem:[%s6505_s2 + $0x530] sm:$0xff] }
  0x9c   : > { %2801 = vmatpush.bf16.msrb.mxu1 %v5083_v27  ;;  %v5152_v27 = vld [vmem:[%s6505_s2 + $0x570] sm:$0xff] }
  0x9d   : > { %2814 = vmatpush.bf16.msrb.mxu2 %v5091_v29  ;;  %v5168_v29 = vld [vmem:[%s6505_s2 + $0x5f0] sm:$0xff] }
  0x9e   : > { %2827 = vmatpush.bf16.msrb.mxu3 %v5099_v31  ;;  %v5151_v31 = vld [vmem:[%s6505_s2 + $0x568] sm:$0xff] }
  0x9f   : > { %2789 = vmatpush.bf16.msrb.mxu0 %v5074_v32  ;;  %v5159_v32 = vld [vmem:[%s6505_s2 + $0x5a8] sm:$0xff] }
  0xa0   : > { %2802 = vmatpush.bf16.msrb.mxu1 %v5082_v34  ;;  %v5167_v34 = vld [vmem:[%s6505_s2 + $0x5e8] sm:$0xff] }
  0xa1   : > { %2815 = vmatpush.bf16.msrb.mxu2 %v5090_v38  ;;  %v5158_v38 = vld [vmem:[%s6505_s2 + $0x5a0] sm:$0xff] }
  0xa2   : > { %2828 = vmatpush.bf16.msrb.mxu3 %v5098_v42  ;;  %2790 = vmatmul.bf16.vlgmr.msrb.gmra.mxu0 %v1038_v43  ;;  %v5141_v43 = vld [vmem:[%s6505_s2 + $0x518] sm:$0xff] }
  0xa3   : > { %2834 = vmatpush.bf16.msra.mxu0 %v5113_v35  ;;  %2803 = vmatmul.bf16.vlgmr.msrb.gmra.mxu1 %v1039_v46  ;;  %v5142_v35 = vld [vmem:[%s6505_s2 + $0x520] sm:$0xff]  ;;  %v5165_v46 = vld [vmem:[%s6505_s2 + $0x5d8] sm:$0xff] }
  0xa4   : > { %2847 = vmatpush.bf16.msra.mxu1 %v5121_v39  ;;  %2816 = vmatmul.bf16.vlgmr.msrb.gmra.mxu2 %v1040_v45  ;;  %v5157_v45 = vld [vmem:[%s6505_s2 + $0x598] sm:$0xff] }
  0xa5   : > { %2860 = vmatpush.bf16.msra.mxu2 %v5129_v41  ;;  %2829 = vmatmul.bf16.vlgmr.msrb.gmra.mxu3 %v1041_v47  ;;  %v5166_v41 = vld [vmem:[%s6505_s2 + $0x5e0] sm:$0xff] }
  0xa6   : > { %2873 = vmatpush.bf16.msra.mxu3 %v5137_v44  ;;  %v5149_v44 = vld [vmem:[%s6505_s2 + $0x558] sm:$0xff] }
  0xa7   : > { %2835 = vmatpush.bf16.msra.mxu0 %v5112_v48  ;;  %v5140_v48 = vld [vmem:[%s6505_s2 + $0x510] sm:$0xff] }
  0xa8   : > { %2848 = vmatpush.bf16.msra.mxu1 %v5120_v49 }
  0xa9   : > { %2861 = vmatpush.bf16.msra.mxu2 %v5128_v50 }
  0xaa   : > { %2874 = vmatpush.bf16.msra.mxu3 %v5136_v51  ;;  %v5148_v51 = vld [vmem:[%s6505_s2 + $0x550] sm:$0xff] }
  0xab   : > { %2836 = vmatpush.bf16.msra.mxu0 %v5111_v52  ;;  %v5156_v52 = vld [vmem:[%s6505_s2 + $0x590] sm:$0xff] }
  0xac   : > { %2849 = vmatpush.bf16.msra.mxu1 %v5119_v53 }
  0xad   : > { %2862 = vmatpush.bf16.msra.mxu2 %v5127_v54 }
  0xae   : > { %2875 = vmatpush.bf16.msra.mxu3 %v5135_v55  ;;  %v5164_v55 = vld [vmem:[%s6505_s2 + $0x5d0] sm:$0xff] }
  0xaf   : > { %2837 = vmatpush.bf16.msra.mxu0 %v5110_v56 }
  0xb0   : > { %2850 = vmatpush.bf16.msra.mxu1 %v5118_v57  ;;  %v5139_v57 = vld [vmem:[%s6505_s2 + $0x508] sm:$0xff] }
  0xb1   : > { %2863 = vmatpush.bf16.msra.mxu2 %v5126_v58  ;;  %v5147_v58 = vld [vmem:[%s6505_s2 + $0x548] sm:$0xff] }
  0xb2   : > { %2876 = vmatpush.bf16.msra.mxu3 %v5134_v59  ;;  %v5155_v59 = vld [vmem:[%s6505_s2 + $0x588] sm:$0xff] }
  0xb3   : > { %2838 = vmatpush.bf16.msra.mxu0 %v5109_v60  ;;  %v456_v60 = vld [vmem:[%s6503_s0 + $0x50] sm:$0xff] }
  0xb4   : > { %2851 = vmatpush.bf16.msra.mxu1 %v5117_v61  ;;  %v457_v61 = vld [vmem:[%s6503_s0 + $0x58] sm:$0xff] }
  0xb5   : > { %2864 = vmatpush.bf16.msra.mxu2 %v5125_v62  ;;  %v5163_v62 = vld [vmem:[%s6505_s2 + $0x5c8] sm:$0xff]  ;;  %v1017_v8 = vunpack.c.h.b16 %v457_v61 }
  0xb6   : > { %2877 = vmatpush.bf16.msra.mxu3 %v5133_v63 }
  0xb7   : > { %2839 = vmatpush.bf16.msra.mxu0 %v5108_v0  ;;  %v5138_v0 = vld [vmem:[%s6505_s2 + $0x500] sm:$0xff] }
  0xb8   : > { %2852 = vmatpush.bf16.msra.mxu1 %v5116_v1  ;;  %v1014_v1 = vunpack.c.l.b16 %v456_v60 }
  0xb9   : > { %2865 = vmatpush.bf16.msra.mxu2 %v5124_v2  ;;  %v1016_v2 = vunpack.c.l.b16 %v457_v61  ;;  %v5209_v61 = vld [vmem:[%s6505_s2 + $0x738] sm:$0xff] }
  0xba   : > { %2878 = vmatpush.bf16.msra.mxu3 %v5132_v3  ;;  %v5146_v3 = vld [vmem:[%s6505_s2 + $0x540] sm:$0xff]  ;;  %v1046_v12 = vpack.c.b16 %v1014_v1, %v1014_v1 }
  0xbb   : > { %2840 = vmatpush.bf16.msra.mxu0 %v5107_v4  ;;  %v5154_v4 = vld [vmem:[%s6505_s2 + $0x580] sm:$0xff] }
  0xbc   : > { %2853 = vmatpush.bf16.msra.mxu1 %v5115_v5  ;;  %v1015_v5 = vunpack.c.h.b16 %v456_v60  ;;  %v5194_v1 = vld [vmem:[%s6505_s2 + $0x6c0] sm:$0xff] }
  0xbd   : > { %2866 = vmatpush.bf16.msra.mxu2 %v5123_v6  ;;  %v5177_v6 = vld [vmem:[%s6505_s2 + $0x638] sm:$0xff] }
  0xbe   : > { %2879 = vmatpush.bf16.msra.mxu3 %v5131_v9  ;;  %v1047_v15 = vpack.c.b16 %v1015_v5, %v1015_v5 }
  0xbf   : > { %2841 = vmatpush.bf16.msra.mxu0 %v5106_v10  ;;  %v2635_v36 = vpop.f32.mrf.mxu0  ;;  %v5193_v10 = vld [vmem:[%s6505_s2 + $0x6b8] sm:$0xff] }
  0xc0   : > { %2854 = vmatpush.bf16.msra.mxu1 %v5114_v13  ;;  %v2636_v39 = vadd.f32 %v5287_v33, %v2635_v36  ;;  %v2648_v40 = vpop.f32.mrf.mxu1  ;;  %v1048_v13 = vpack.c.b16 %v1016_v2, %v1016_v2 }
  0xc1   : > { %2867 = vmatpush.bf16.msra.mxu2 %v5122_v14  ;;  %v5201_v14 = vld [vmem:[%s6505_s2 + $0x6f8] sm:$0xff] }
  0xc2   : > { %2880 = vmatpush.bf16.msra.mxu3 %v5130_v20  ;;  %2842 = vmatmul.bf16.vlgmr.msra.gmra.mxu0 %v1042_v21  ;;  %v2649_v42 = vadd.f32 %v2648_v40, %v2636_v39  ;;  %v5200_v20 = vld [vmem:[%s6505_s2 + $0x6f0] sm:$0xff]  ;;  %v5175_v21 = vld [vmem:[%s6505_s2 + $0x628] sm:$0xff] }
  0xc3   : > { %2886 = vmatpush.bf16.msrb.mxu0 %v5145_v16  ;;  %2855 = vmatmul.bf16.vlgmr.msra.gmra.mxu1 %v1043_v24  ;;  %v1049_v16 = vpack.c.b16 %v1017_v8, %v1017_v8  ;;  %v5199_v24 = vld [vmem:[%s6505_s2 + $0x6e8] sm:$0xff]  ;;  %v5172_v39 = vld [vmem:[%s6505_s2 + $0x610] sm:$0xff] }
  0xc4   : > { %2899 = vmatpush.bf16.msrb.mxu1 %v5153_v17  ;;  %2868 = vmatmul.bf16.vlgmr.msra.gmra.mxu2 %v1044_v22  ;;  %v5176_v17 = vld [vmem:[%s6505_s2 + $0x630] sm:$0xff]  ;;  %v5183_v22 = vld [vmem:[%s6505_s2 + $0x668] sm:$0xff] }
  0xc5   : > { %2912 = vmatpush.bf16.msrb.mxu2 %v5161_v19  ;;  %2881 = vmatmul.bf16.vlgmr.msra.gmra.mxu3 %v1045_v25  ;;  %v5192_v19 = vld [vmem:[%s6505_s2 + $0x6b0] sm:$0xff]  ;;  %v5174_v25 = vld [vmem:[%s6505_s2 + $0x620] sm:$0xff] }
  0xc6   : > { %2925 = vmatpush.bf16.msrb.mxu3 %v5169_v23  ;;  %v5191_v23 = vld [vmem:[%s6505_s2 + $0x6a8] sm:$0xff]  ;;  %v5180_v40 = vld [vmem:[%s6505_s2 + $0x650] sm:$0xff] }
  0xc7   : > { %2887 = vmatpush.bf16.msrb.mxu0 %v5144_v26  ;;  %v2661_v47 = vpop.f32.mrf.mxu2  ;;  %v2637_v50 = vpop.f32.mrf.mxu0  ;;  %v5182_v26 = vld [vmem:[%s6505_s2 + $0x660] sm:$0xff]  ;;  %v5216_v8 = vld [vmem:[%s6505_s2 + $0x770] sm:$0xff] }
  0xc8   : > { %2900 = vmatpush.bf16.msrb.mxu1 %v5152_v27  ;;  %v2662_v49 = vadd.f32 %v2661_v47, %v2649_v42  ;;  %v2674_v53 = vpop.f32.mrf.mxu3  ;;  %v2650_v54 = vpop.f32.mrf.mxu1  ;;  %v5190_v27 = vld [vmem:[%s6505_s2 + $0x6a0] sm:$0xff]  ;;  %v5171_v47 = vld [vmem:[%s6505_s2 + $0x608] sm:$0xff] }
  0xc9   : > { %2913 = vmatpush.bf16.msrb.mxu2 %v5160_v28  ;;  %v458_v50 = vld [vmem:[%s6503_s0 + $0x60] sm:$0xff] }
  0xca   : > { %2926 = vmatpush.bf16.msrb.mxu3 %v5168_v29  ;;  %v6122_v56 = vadd.f32 %v2674_v53, %v2662_v49  ;;  %v5187_v49 = vld [vmem:[%s6505_s2 + $0x688] sm:$0xff]  ;;  %v5170_v54 = vld [vmem:[%s6505_s2 + $0x600] sm:$0xff] }
  0xcb   : > { %2888 = vmatpush.bf16.msrb.mxu0 %v5143_v30  ;;  %v5195_v53 = vld [vmem:[%s6505_s2 + $0x6c8] sm:$0xff] }
  0xcc   : > { %2901 = vmatpush.bf16.msrb.mxu1 %v5151_v31  ;;  %v5198_v31 = vld [vmem:[%s6505_s2 + $0x6e0] sm:$0xff] }
  0xcd   : > { %2914 = vmatpush.bf16.msrb.mxu2 %v5159_v32  ;;  %v5173_v32 = vld [vmem:[%s6505_s2 + $0x618] sm:$0xff] }
  0xce   : > { %2927 = vmatpush.bf16.msrb.mxu3 %v5167_v34  ;;  %v5181_v34 = vld [vmem:[%s6505_s2 + $0x658] sm:$0xff] }
  0xcf   : > { %2889 = vmatpush.bf16.msrb.mxu0 %v5142_v35  ;;  %v2663_v63 = vpop.f32.mrf.mxu2  ;;  %v5189_v35 = vld [vmem:[%s6505_s2 + $0x698] sm:$0xff] }
  0xd0   : > { %2902 = vmatpush.bf16.msrb.mxu1 %v5150_v37  ;;  %v2676_v9 = vpop.f32.mrf.mxu3  ;;  %v5197_v37 = vld [vmem:[%s6505_s2 + $0x6d8] sm:$0xff] }
  0xd1   : > { %2915 = vmatpush.bf16.msrb.mxu2 %v5158_v38  ;;  %v5224_v9 = vld [vmem:[%s6505_s2 + $0x7b0] sm:$0xff] }
  0xd2   : > { %2928 = vmatpush.bf16.msrb.mxu3 %v5166_v41  ;;  %v5188_v41 = vld [vmem:[%s6505_s2 + $0x690] sm:$0xff] }
  0xd3   : > { %2890 = vmatpush.bf16.msrb.mxu0 %v5141_v43 }
  0xd4   : > { %2903 = vmatpush.bf16.msrb.mxu1 %v5149_v44 }
  0xd5   : > { %2916 = vmatpush.bf16.msrb.mxu2 %v5157_v45 }
  0xd6   : > { %2929 = vmatpush.bf16.msrb.mxu3 %v5165_v46  ;;  %v5196_v46 = vld [vmem:[%s6505_s2 + $0x6d0] sm:$0xff] }
  0xd7   : > { %2891 = vmatpush.bf16.msrb.mxu0 %v5140_v48  ;;  %v5179_v48 = vld [vmem:[%s6505_s2 + $0x648] sm:$0xff] }
  0xd8   : > { %2904 = vmatpush.bf16.msrb.mxu1 %v5148_v51  ;;  %v459_v51 = vld [vmem:[%s6503_s0 + $0x68] sm:$0xff] }
  0xd9   : > { %2917 = vmatpush.bf16.msrb.mxu2 %v5156_v52  ;;  %v1021_v63 = vunpack.c.h.b16 %v459_v51 }
  0xda   : > { %2930 = vmatpush.bf16.msrb.mxu3 %v5164_v55  ;;  %v1018_v55 = vunpack.c.l.b16 %v458_v50 }
  0xdb   : > { %2892 = vmatpush.bf16.msrb.mxu0 %v5139_v57  ;;  %v5178_v57 = vld [vmem:[%s6505_s2 + $0x640] sm:$0xff] }
  0xdc   : > { %2905 = vmatpush.bf16.msrb.mxu1 %v5147_v58  ;;  %v5186_v58 = vld [vmem:[%s6505_s2 + $0x680] sm:$0xff]  ;;  %v1050_v2 = vpack.c.b16 %v1018_v55, %v1018_v55 }
  0xdd   : > { %2918 = vmatpush.bf16.msrb.mxu2 %v5155_v59  ;;  %v1019_v59 = vunpack.c.h.b16 %v458_v50  ;;  %v5218_v50 = vld [vmem:[%s6505_s2 + $0x780] sm:$0xff] }
  0xde   : > { %2931 = vmatpush.bf16.msrb.mxu3 %v5163_v62  ;;  %v5217_v62 = vld [vmem:[%s6505_s2 + $0x778] sm:$0xff] }
  0xdf   : > { %2893 = vmatpush.bf16.msrb.mxu0 %v5138_v0  ;;  %v2687_v28 = vpop.f32.mrf.mxu0  ;;  %v5225_v0 = vld [vmem:[%s6505_s2 + $0x7b8] sm:$0xff]  ;;  %v1051_v5 = vpack.c.b16 %v1019_v59, %v1019_v59  ;;  %v5238_v59 = vld [vmem:[%s6507_s4] sm:$0xff] }
  0xe0   : > { %2906 = vmatpush.bf16.msrb.mxu1 %v5146_v3  ;;  %v2700_v29 = vpop.f32.mrf.mxu1  ;;  %v2688_v30 = vadd.f32 %v2687_v28, %v6122_v56  ;;  %v1020_v56 = vunpack.c.l.b16 %v459_v51  ;;  %v5229_v28 = vld [vmem:[%s6505_s2 + $0x7d8] sm:$0xff]  ;;  %v5239_v51 = vld [vmem:[%s6507_s4 + $0x8] sm:$0xff] }
  0xe1   : > { %2919 = vmatpush.bf16.msrb.mxu2 %v5154_v4  ;;  %v5233_v4 = vld [vmem:[%s6505_s2 + $0x7f8] sm:$0xff] }
  0xe2   : > { %2932 = vmatpush.bf16.msrb.mxu3 %v5162_v11  ;;  %2894 = vmatmul.bf16.vlgmr.msrb.gmra.mxu0 %v1046_v12  ;;  %v2701_v33 = vadd.f32 %v2700_v29, %v2688_v30  ;;  %v1052_v3 = vpack.c.b16 %v1020_v56, %v1020_v56  ;;  %v5207_v11 = vld [vmem:[%s6505_s2 + $0x728] sm:$0xff] }
  0xe3   : > { %2938 = vmatpush.bf16.msra.mxu0 %v5177_v6  ;;  %2907 = vmatmul.bf16.vlgmr.msrb.gmra.mxu1 %v1047_v15  ;;  %v1053_v6 = vpack.c.b16 %v1021_v63, %v1021_v63  ;;  %v5215_v12 = vld [vmem:[%s6505_s2 + $0x768] sm:$0xff] }
  0xe4   : > { %2951 = vmatpush.bf16.msra.mxu1 %v5185_v7  ;;  %2920 = vmatmul.bf16.vlgmr.msrb.gmra.mxu2 %v1048_v13  ;;  %v5208_v7 = vld [vmem:[%s6505_s2 + $0x730] sm:$0xff]  ;;  %v5223_v13 = vld [vmem:[%s6505_s2 + $0x7a8] sm:$0xff] }
  0xe5   : > { %2964 = vmatpush.bf16.msra.mxu2 %v5193_v10  ;;  %2933 = vmatmul.bf16.vlgmr.msrb.gmra.mxu3 %v1049_v16  ;;  %v5232_v10 = vld [vmem:[%s6505_s2 + $0x7f0] sm:$0xff] }
  0xe6   : > { %2977 = vmatpush.bf16.msra.mxu3 %v5201_v14  ;;  %v5231_v14 = vld [vmem:[%s6505_s2 + $0x7e8] sm:$0xff] }
  0xe7   : > { %2939 = vmatpush.bf16.msra.mxu0 %v5176_v17  ;;  %v2713_v36 = vpop.f32.mrf.mxu2  ;;  %v2689_v43 = vpop.f32.mrf.mxu0  ;;  %v5206_v17 = vld [vmem:[%s6505_s2 + $0x720] sm:$0xff] }
  0xe8   : > { %2952 = vmatpush.bf16.msra.mxu1 %v5184_v18  ;;  %v2714_v38 = vadd.f32 %v2713_v36, %v2701_v33  ;;  %v2726_v42 = vpop.f32.mrf.mxu3  ;;  %v2702_v45 = vpop.f32.mrf.mxu1  ;;  %v5214_v18 = vld [vmem:[%s6505_s2 + $0x760] sm:$0xff]  ;;  %v5212_v33 = vld [vmem:[%s6505_s2 + $0x750] sm:$0xff]  ;;  %v5227_v43 = vld [vmem:[%s6505_s2 + $0x7c8] sm:$0xff] }
  0xe9   : > { %2965 = vmatpush.bf16.msra.mxu2 %v5192_v19  ;;  %v5222_v19 = vld [vmem:[%s6505_s2 + $0x7a0] sm:$0xff]  ;;  %v5228_v36 = vld [vmem:[%s6505_s2 + $0x7d0] sm:$0xff] }
  0xea   : > { %2978 = vmatpush.bf16.msra.mxu3 %v5200_v20  ;;  %v2727_v44 = vadd.f32 %v2726_v42, %v2714_v38  ;;  %v460_v38 = vld [vmem:[%s6503_s0 + $0x70] sm:$0xff]  ;;  %v5202_v45 = vld [vmem:[%s6505_s2 + $0x700] sm:$0xff] }
  0xeb   : > { %2940 = vmatpush.bf16.msra.mxu0 %v5175_v21 }
  0xec   : > { %2953 = vmatpush.bf16.msra.mxu1 %v5183_v22  ;;  %v5230_v22 = vld [vmem:[%s6505_s2 + $0x7e0] sm:$0xff] }
  0xed   : > { %2966 = vmatpush.bf16.msra.mxu2 %v5191_v23  ;;  %v5205_v23 = vld [vmem:[%s6505_s2 + $0x718] sm:$0xff] }
  0xee   : > { %2979 = vmatpush.bf16.msra.mxu3 %v5199_v24  ;;  %v5213_v24 = vld [vmem:[%s6505_s2 + $0x758] sm:$0xff] }
  0xef   : > { %2941 = vmatpush.bf16.msra.mxu0 %v5174_v25  ;;  %v2715_v52 = vpop.f32.mrf.mxu2  ;;  %v5221_v25 = vld [vmem:[%s6505_s2 + $0x798] sm:$0xff] }
  0xf0   : > { %2954 = vmatpush.bf16.msra.mxu1 %v5182_v26  ;;  %v2728_v60 = vpop.f32.mrf.mxu3 }
  0xf1   : > { %2967 = vmatpush.bf16.msra.mxu2 %v5190_v27  ;;  %v6374_v60 = vld [vmem:[%s6508_s5] sm:$0xff] }
  0xf2   : > { %2980 = vmatpush.bf16.msra.mxu3 %v5198_v31  ;;  %v5204_v31 = vld [vmem:[%s6505_s2 + $0x710] sm:$0xff] }
  0xf3   : > { %2942 = vmatpush.bf16.msra.mxu0 %v5173_v32 }
  0xf4   : > { %2955 = vmatpush.bf16.msra.mxu1 %v5181_v34  ;;  %v5220_v34 = vld [vmem:[%s6505_s2 + $0x790] sm:$0xff] }
  0xf5   : > { %2968 = vmatpush.bf16.msra.mxu2 %v5189_v35 }
  0xf6   : > { %2981 = vmatpush.bf16.msra.mxu3 %v5197_v37  ;;  %v5203_v37 = vld [vmem:[%s6505_s2 + $0x708] sm:$0xff] }
  0xf7   : > { %2943 = vmatpush.bf16.msra.mxu0 %v5172_v39  ;;  %v5211_v39 = vld [vmem:[%s6505_s2 + $0x748] sm:$0xff] }
  0xf8   : > { %2956 = vmatpush.bf16.msra.mxu1 %v5180_v40  ;;  %v5219_v40 = vld [vmem:[%s6505_s2 + $0x788] sm:$0xff] }
  0xf9   : > { %2969 = vmatpush.bf16.msra.mxu2 %v5188_v41  ;;  %v461_v41 = vld [vmem:[%s6503_s0 + $0x78] sm:$0xff] }
  0xfa   : > { %2982 = vmatpush.bf16.msra.mxu3 %v5196_v46  ;;  %v1023_v46 = vunpack.c.h.b16 %v460_v38  ;;  %v1025_v52 = vunpack.c.h.b16 %v461_v41 }
  0xfb   : > { %2944 = vmatpush.bf16.msra.mxu0 %v5171_v47  ;;  %v1024_v47 = vunpack.c.l.b16 %v461_v41 }
  0xfc   : > { %2957 = vmatpush.bf16.msra.mxu1 %v5179_v48  ;;  %v1055_v56 = vpack.c.b16 %v1023_v46, %v1023_v46 }
  0xfd   : > { %2970 = vmatpush.bf16.msra.mxu2 %v5187_v49  ;;  %v5210_v49 = vld [vmem:[%s6505_s2 + $0x740] sm:$0xff] }
  0xfe   : > { %2983 = vmatpush.bf16.msra.mxu3 %v5195_v53  ;;  %v6362_v53 = vld [vmem:[%s6508_s5 + $0x8] sm:$0xff] }
  0xff   : > { %2945 = vmatpush.bf16.msra.mxu0 %v5170_v54  ;;  %v2739_v15 = vpop.f32.mrf.mxu0  ;;  %v5226_v54 = vld [vmem:[%s6505_s2 + $0x7c0] sm:$0xff] }
 0x100   : > { %2958 = vmatpush.bf16.msra.mxu1 %v5178_v57  ;;  %v2740_v16 = vadd.f32 %v2739_v15, %v2727_v44  ;;  %v2752_v20 = vpop.f32.mrf.mxu1  ;;  %v1022_v44 = vunpack.c.l.b16 %v460_v38  ;;  %v1056_v57 = vpack.c.b16 %v1024_v47, %v1024_v47 }
 0x101   : > { %2971 = vmatpush.bf16.msra.mxu2 %v5186_v58  ;;  %v1057_v58 = vpack.c.b16 %v1025_v52, %v1025_v52 }
 0x102   : > { %2984 = vmatpush.bf16.msra.mxu3 %v5194_v1  ;;  %2946 = vmatmul.bf16.vlgmr.msra.gmra.mxu0 %v1050_v2  ;;  %v2753_v21 = vadd.f32 %v2752_v20, %v2740_v16  ;;  %v1054_v55 = vpack.c.b16 %v1022_v44, %v1022_v44  ;;  %v5234_v1 = vld [vmem:[%s6504_s1] sm:$0xff] }
 0x103   : > { %2990 = vmatpush.bf16.msrb.mxu0 %v5209_v61  ;;  %2959 = vmatmul.bf16.vlgmr.msra.gmra.mxu1 %v1051_v5 }
 0x104   : > { %3003 = vmatpush.bf16.msrb.mxu1 %v5217_v62  ;;  %2972 = vmatmul.bf16.vlgmr.msra.gmra.mxu2 %v1052_v3 }
 0x105   : > { %3016 = vmatpush.bf16.msrb.mxu2 %v5225_v0  ;;  %2985 = vmatmul.bf16.vlgmr.msra.gmra.mxu3 %v1053_v6 }
 0x106   : > { %3029 = vmatpush.bf16.msrb.mxu3 %v5233_v4 }
 0x107   : > { %2991 = vmatpush.bf16.msrb.mxu0 %v5208_v7  ;;  %v2765_v26 = vpop.f32.mrf.mxu2  ;;  %v2741_v29 = vpop.f32.mrf.mxu0 }
 0x108   : > { %3004 = vmatpush.bf16.msrb.mxu1 %v5216_v8  ;;  %v2766_v27 = vadd.f32 %v2765_v26, %v2753_v21  ;;  %v2778_v30 = vpop.f32.mrf.mxu3  ;;  %v2754_v35 = vpop.f32.mrf.mxu1  ;;  %v5420_v8 = vmov 0  }
 0x109   : > { %3017 = vmatpush.bf16.msrb.mxu2 %v5224_v9 }
 0x10a   : > { %3030 = vmatpush.bf16.msrb.mxu3 %v5232_v10  ;;  %v2779_v32 = vadd.f32 %v2778_v30, %v2766_v27 }
 0x10b   : > { %2992 = vmatpush.bf16.msrb.mxu0 %v5207_v11 }
 0x10c   : > { %3005 = vmatpush.bf16.msrb.mxu1 %v5215_v12 }
 0x10d   : > { %3018 = vmatpush.bf16.msrb.mxu2 %v5223_v13 }
 0x10e   : > { %3031 = vmatpush.bf16.msrb.mxu3 %v5231_v14 }
 0x10f   : > { %2993 = vmatpush.bf16.msrb.mxu0 %v5206_v17  ;;  %v2767_v42 = vpop.f32.mrf.mxu2 }
 0x110   : > { %3006 = vmatpush.bf16.msrb.mxu1 %v5214_v18  ;;  %v2780_v48 = vpop.f32.mrf.mxu3 }
 0x111   : > { %3019 = vmatpush.bf16.msrb.mxu2 %v5222_v19 }
 0x112   : > { %3032 = vmatpush.bf16.msrb.mxu3 %v5230_v22 }
 0x113   : > { %2994 = vmatpush.bf16.msrb.mxu0 %v5205_v23 }
 0x114   : > { %3007 = vmatpush.bf16.msrb.mxu1 %v5213_v24 }
 0x115   : > { %3020 = vmatpush.bf16.msrb.mxu2 %v5221_v25 }
 0x116   : > { %3033 = vmatpush.bf16.msrb.mxu3 %v5229_v28 }
 0x117   : > { %2995 = vmatpush.bf16.msrb.mxu0 %v5204_v31 }
 0x118   : > { %3008 = vmatpush.bf16.msrb.mxu1 %v5212_v33 }
 0x119   : > { %3021 = vmatpush.bf16.msrb.mxu2 %v5220_v34 }
 0x11a   : > { %3034 = vmatpush.bf16.msrb.mxu3 %v5228_v36 }
 0x11b   : > { %2996 = vmatpush.bf16.msrb.mxu0 %v5203_v37 }
 0x11c   : > { %3009 = vmatpush.bf16.msrb.mxu1 %v5211_v39 }
 0x11d   : > { %3022 = vmatpush.bf16.msrb.mxu2 %v5219_v40 }
 0x11e   : > { %3035 = vmatpush.bf16.msrb.mxu3 %v5227_v43 }
 0x11f   : > { %2997 = vmatpush.bf16.msrb.mxu0 %v5202_v45  ;;  %v2791_v61 = vpop.f32.mrf.mxu0 }
 0x120   : > { %3010 = vmatpush.bf16.msrb.mxu1 %v5210_v49  ;;  %v2792_v62 = vadd.f32 %v2791_v61, %v2779_v32  ;;  %v2804_v63 = vpop.f32.mrf.mxu1 }
 0x121   : > { %3023 = vmatpush.bf16.msrb.mxu2 %v5218_v50 }
 0x122   : > { %3036 = vmatpush.bf16.msrb.mxu3 %v5226_v54  ;;  %2998 = vmatmul.bf16.vlgmr.msrb.gmra.mxu0 %v1054_v55  ;;  %v2805_v0 = vadd.f32 %v2804_v63, %v2792_v62 }
 0x123   : > { %3110 = vmatpush.bf16.msra.mxu0 %v5239_v51  ;;  %3011 = vmatmul.bf16.vlgmr.msrb.gmra.mxu1 %v1055_v56 }
 0x124   : > { %3158 = vmatpush.bf16.msra.mxu1 %v6362_v53  ;;  %3024 = vmatmul.bf16.vlgmr.msrb.gmra.mxu2 %v1056_v57 }
 0x125   : > { %3216 = vmatpush.bf16.msra.mxu2 %v6362_v53  ;;  %3037 = vmatmul.bf16.vlgmr.msrb.gmra.mxu3 %v1057_v58  ;;  %v6398_v58 = vld [vmem:[%s6509_s6] ss:$0 sm:$0xff] }
 0x126   : > { %3274 = vmatpush.bf16.msra.mxu3 %v6362_v53 }
 0x127   : > { %3111 = vmatpush.bf16.msra.mxu0 %v5238_v59  ;;  %v2817_v2 = vpop.f32.mrf.mxu2  ;;  %v2793_v5 = vpop.f32.mrf.mxu0 }
 0x128   : > { %3159 = vmatpush.bf16.msra.mxu1 %v6374_v60  ;;  %v2818_v3 = vadd.f32 %v2817_v2, %v2805_v0  ;;  %v2830_v4 = vpop.f32.mrf.mxu3  ;;  %v2806_v6 = vpop.f32.mrf.mxu1 }
 0x129   : > { %3217 = vmatpush.bf16.msra.mxu2 %v6374_v60 }
 0x12a   : > { %3275 = vmatpush.bf16.msra.mxu3 %v6374_v60  ;;  %v2831_v7 = vadd.f32 %v2830_v4, %v2818_v3 }
 0x12c   : > { %3332 = vmatpush.bf16.msrb.mxu1 %v6362_v53 }
 0x12d   : > { %3390 = vmatpush.bf16.msrb.mxu2 %v6362_v53 }
 0x12e   : > { %3448 = vmatpush.bf16.msrb.mxu3 %v6362_v53 }
 0x12f   : > { %v2819_v9 = vpop.f32.mrf.mxu2 }
 0x130   : > { %3333 = vmatpush.bf16.msrb.mxu1 %v6374_v60  ;;  %v2832_v10 = vpop.f32.mrf.mxu3 }
 0x131   : > { %3391 = vmatpush.bf16.msrb.mxu2 %v6374_v60 }
 0x132   : > { %3449 = vmatpush.bf16.msrb.mxu3 %v6374_v60  ;;  %4916 = vmatmul.msk.bf16.vlgmr.msra.gmra.mxu0 %vm3091_vm0, %v5234_v1 }
 0x133   : > { %3160 = vmatmul.bf16.vlgmr.msra.gmra.mxu1 %v5420_v8 }
 0x134   : > { %3506 = vmatpush.bf16.msra.mxu1 %v6362_v53 }
 0x138   : > { %3507 = vmatpush.bf16.msra.mxu1 %v6374_v60 }
 0x13f   : > { %v2843_v11 = vpop.f32.mrf.mxu0 }
 0x140   : > { %v2844_v12 = vadd.f32 %v2843_v11, %v2831_v7  ;;  %v2856_v13 = vpop.f32.mrf.mxu1 }
 0x142   : > { %v2857_v14 = vadd.f32 %v2856_v13, %v2844_v12 }
 0x147   : > { %v2869_v15 = vpop.f32.mrf.mxu2  ;;  %v2845_v18 = vpop.f32.mrf.mxu0 }
 0x148   : > { %v2870_v16 = vadd.f32 %v2869_v15, %v2857_v14  ;;  %v2882_v17 = vpop.f32.mrf.mxu3  ;;  %v2858_v20 = vpop.f32.mrf.mxu1 }
 0x14a   : > { %v2883_v19 = vadd.f32 %v2882_v17, %v2870_v16 }
 0x14f   : > { %v2871_v21 = vpop.f32.mrf.mxu2 }
 0x150   : > { %v2884_v22 = vpop.f32.mrf.mxu3 }
 0x15f   : > { %v2895_v23 = vpop.f32.mrf.mxu0 }
 0x160   : > { %v2896_v24 = vadd.f32 %v2895_v23, %v2883_v19  ;;  %v2908_v25 = vpop.f32.mrf.mxu1 }
 0x162   : > { %v2909_v26 = vadd.f32 %v2908_v25, %v2896_v24 }
 0x167   : > { %v2921_v27 = vpop.f32.mrf.mxu2  ;;  %v2897_v30 = vpop.f32.mrf.mxu0 }
 0x168   : > { %v2922_v28 = vadd.f32 %v2921_v27, %v2909_v26  ;;  %v2934_v29 = vpop.f32.mrf.mxu3  ;;  %v2910_v32 = vpop.f32.mrf.mxu1 }
 0x16a   : > { %v2935_v31 = vadd.f32 %v2934_v29, %v2922_v28 }
 0x16f   : > { %v2923_v33 = vpop.f32.mrf.mxu2 }
 0x170   : > { %v2936_v34 = vpop.f32.mrf.mxu3 }
 0x17f   : > { %v2947_v35 = vpop.f32.mrf.mxu0 }
 0x180   : > { %v2948_v36 = vadd.f32 %v2947_v35, %v2935_v31  ;;  %v2960_v37 = vpop.f32.mrf.mxu1 }
 0x182   : > { %v2961_v38 = vadd.f32 %v2960_v37, %v2948_v36 }
 0x187   : > { %v2973_v39 = vpop.f32.mrf.mxu2  ;;  %v2949_v42 = vpop.f32.mrf.mxu0 }
 0x188   : > { %v2974_v40 = vadd.f32 %v2973_v39, %v2961_v38  ;;  %v2986_v41 = vpop.f32.mrf.mxu3  ;;  %v2962_v44 = vpop.f32.mrf.mxu1 }
 0x18a   : > { %v2987_v43 = vadd.f32 %v2986_v41, %v2974_v40 }
 0x18f   : > { %v2975_v45 = vpop.f32.mrf.mxu2 }
 0x190   : > { %v2988_v46 = vpop.f32.mrf.mxu3 }
 0x19f   : > { %v2999_v47 = vpop.f32.mrf.mxu0 }
 0x1a0   : > { %v3000_v48 = vadd.f32 %v2999_v47, %v2987_v43  ;;  %v3012_v49 = vpop.f32.mrf.mxu1 }
 0x1a2   : > { %v3013_v50 = vadd.f32 %v3012_v49, %v3000_v48 }
 0x1a7   : > { %v3025_v51 = vpop.f32.mrf.mxu2  ;;  %v3001_v54 = vpop.f32.mrf.mxu0 }
 0x1a8   : > { %v3026_v52 = vadd.f32 %v3025_v51, %v3013_v50  ;;  %v3014_v55 = vpop.f32.mrf.mxu1  ;;  %v3038_v56 = vpop.f32.mrf.mxu3  ;;  %v5235_v50 = vld [vmem:[%s6504_s1 + $0x8] sm:$0xff] }
 0x1a9   : > { %4917 = vmatmul.msk.bf16.gmra.mxu0 %vm3091_vm0, %v5235_v50 }
 0x1aa   : > { %v6393_v57 = vadd.f32 %v3038_v56, %v3026_v52 }
 0x1af   : > { %v3027_v59 = vpop.f32.mrf.mxu2  ;;  %v3113_v61 = vpop.f32.mrf.mxu0 }
 0x1b0   : > { %v3114_v62 = vadd.f32 %v6398_v58, %v3113_v61  ;;  %v3161_v63 = vpop.f32.mrf.mxu1  ;;  %v3040_v0 = vpop.f32.mrf.mxu3 }
 0x1b2   : > { %v3165_v1 = vadd.f32 %v3161_v63, %v3114_v62 }
 0x1b4   : > { %5290 = vtanh.f32 %v3165_v1  ;;  %v4928_v4 = vmul.f32 -1.442695, %v3165_v1 }
 0x1b6   : > { %5292 = vpow2.f32 %v4928_v4 }
 0x1b7   : > { %v3115_v27 = vpop.f32.mrf.mxu0 }
 0x1b8   : > { %v3163_v2 = vpop.f32.mrf.mxu1  ;;  %v3116_v28 = vadd.f32 %v6398_v58, %v3115_v27 }
 0x1ba   : > { %v5291_v3 = vpop.eup %5290 }
 0x1bb   : > { %3188 = vrot.lane.b32.xlu0 %v5291_v3, %s5421_s30 }
 0x1bc   : > { %v5293_v5 = vpop.eup %5292 }
 0x1bd   : > { %v3169_v6 = vadd.f32 1.0, %v5293_v5 }
 0x1bf   : > { %5294 = vrcp.f32 %v3169_v6  ;;  %v3181_v12 = vand.u32 2147483648, %v3169_v6  ;;  %vm3175_vm2 = vweird.f32 %v3169_v6  ;;  %v3179_v13 = vand.u32 2147483647, %v3169_v6 }
 0x1c1   : > { %v3182_v15 = vor.u32 1.1754944e-38, %v3181_v12  ;;  %vm3180_vm4 = vcmp.eq.f32.partialorder %v3179_v13, 8.507059e+37 }
 0x1c5   : > { %v5295_v7 = vpop.eup %5294 }
 0x1c6   : > { %v3171_v8 = vmul.f32 %v5295_v7, %v3169_v6  ;;  %vm3176_vm1 = vweird.f32 %v5295_v7 }
 0x1c7   : > { %vm3177_vm3 = vmor %vm3175_vm2, %vm3176_vm1 }
 0x1c8   : > { %v3172_v9 = vsub.f32 1.0, %v3171_v8 }
 0x1ca   : > { %v3173_v10 = vmul.f32 %v5295_v7, %v3172_v9 }
 0x1cc   : > { %v3174_v11 = vadd.f32 %v5295_v7, %v3173_v10 }
 0x1ce   : > { %v3178_v14 = vsel %vm3177_vm3, %v5295_v7, %v3174_v11 }
 0x1cf   : > { %v3183_v17 = vsel %vm3180_vm4, %v3182_v15, %v3178_v14 }
 0x1d0   : > { %v3186_v19 = vmul.f32 0.0, %v3183_v17 }
 0x226   : > { %v3118_v56 = vpop.f32.mrf.mxu0 }
 0x227   : > { %v3119_v59 = vadd.f32 %v6398_v58, %v3118_v56 }
 0x22d   : > { %v3189_v16 = vpop.permute.xlu0 %3188 }
 0x22e   : > { %v3191_v18 = vmul.f32 %v3189_v16, %v3183_v17 }
 0x230   : > { %3193 = vrot.lane.b32.xlu0 %v3191_v18, %s5422_s12 }
 0x2a2   : > { %v3194_v20 = vpop.permute.xlu0 %3193 }
 0x2a3   : > { %v3196_v21 = vadd.f32 %v3194_v20, %v3186_v19 }
 0x2a5   : > { %5296 = vtanh.f32 %v3196_v21 }
 0x2ab   : > { %v5297_v22 = vpop.eup %5296 }
 0x2ac   : > { %3199 = vrot.lane.b32.xlu1 %v5297_v22, %s5421_s30 }
 0x31e   : > { %v3200_v23 = vpop.permute.xlu1 %3199 }
 0x31f   : > { %v3202_v24 = vmul.f32 %v3200_v23, %v3183_v17 }
 0x321   : > { %v3203_v25 = vpack.c.bf16 %v3202_v24, %v3202_v24  ;;  %v3120_v24 = vpop.f32.mrf.mxu0 }
 0x323   : > { %3205 = vrot.lane.b32.xlu1 %v3203_v25, %s5422_s12  ;;  %v3121_v25 = vadd.f32 %v6398_v58, %v3120_v24 }
 0x395   : > { %v3206_v26 = vpop.permute.xlu1 %3205 }
 0x396   : > { %4929 = vmatmul.msk.bf16.vlgmr.msra.gmra.mxu2 %vm3091_vm0, %v3206_v26 }
 0x397   : > { %3564 = vmatpush.bf16.msra.mxu2 %v6362_v53 }
 0x39b   : > { %3565 = vmatpush.bf16.msra.mxu2 %v6374_v60 }
 0x419   : > { %v3219_v29 = vpop.f32.mrf.mxu2 }
 0x41a   : > { %v3223_v30 = vadd.f32 %v3219_v29, %v3116_v28 }
 0x41c   : > { %5298 = vtanh.f32 %v3223_v30  ;;  %v4930_v33 = vmul.f32 -1.442695, %v3223_v30 }
 0x41e   : > { %5300 = vpow2.f32 %v4930_v33 }
 0x421   : > { %v3221_v31 = vpop.f32.mrf.mxu2 }
 0x422   : > { %v5299_v32 = vpop.eup %5298 }
 0x423   : > { %3246 = vrot.lane.b32.xlu2 %v5299_v32, %s5421_s30 }
 0x424   : > { %v5301_v34 = vpop.eup %5300 }
 0x425   : > { %v3227_v35 = vadd.f32 1.0, %v5301_v34 }
 0x427   : > { %5302 = vrcp.f32 %v3227_v35  ;;  %v3239_v39 = vand.u32 2147483648, %v3227_v35  ;;  %vm3233_vm6 = vweird.f32 %v3227_v35  ;;  %v3237_v40 = vand.u32 2147483647, %v3227_v35 }
 0x429   : > { %v3240_v42 = vor.u32 1.1754944e-38, %v3239_v39  ;;  %vm3238_vm8 = vcmp.eq.f32.partialorder %v3237_v40, 8.507059e+37 }
 0x42d   : > { %v5303_v36 = vpop.eup %5302 }
 0x42e   : > { %v3229_v37 = vmul.f32 %v5303_v36, %v3227_v35  ;;  %vm3234_vm5 = vweird.f32 %v5303_v36 }
 0x42f   : > { %vm3235_vm7 = vmor %vm3233_vm6, %vm3234_vm5 }
 0x430   : > { %v3230_v53 = vsub.f32 1.0, %v3229_v37 }
 0x432   : > { %v3231_v38 = vmul.f32 %v5303_v36, %v3230_v53 }
 0x434   : > { %v3232_v60 = vadd.f32 %v5303_v36, %v3231_v38 }
 0x436   : > { %v3236_v41 = vsel %vm3235_vm7, %v5303_v36, %v3232_v60 }
 0x437   : > { %v3241_v44 = vsel %vm3238_vm8, %v3240_v42, %v3236_v41 }
 0x438   : > { %v3244_v46 = vmul.f32 %v3241_v44, %v3196_v21 }
 0x47d   : > { %v3247_v43 = vpop.permute.xlu2 %3246 }
 0x47e   : > { %v3249_v45 = vmul.f32 %v3247_v43, %v3241_v44 }
 0x480   : > { %3251 = vrot.lane.b32.xlu2 %v3249_v45, %s5422_s12 }
 0x4da   : > { %v3252_v47 = vpop.permute.xlu2 %3251 }
 0x4db   : > { %v3254_v48 = vadd.f32 %v3252_v47, %v3244_v46  ;;  %v5236_v47 = vld [vmem:[%s6504_s1 + $0x10] sm:$0xff] }
 0x4dc   : > { %4918 = vmatmul.msk.bf16.gmra.mxu0 %vm3091_vm0, %v5236_v47 }
 0x4dd   : > { %5304 = vtanh.f32 %v3254_v48 }
 0x4e3   : > { %v5305_v49 = vpop.eup %5304 }
 0x4e4   : > { %3257 = vrot.lane.b32.xlu0 %v5305_v49, %s5421_s30 }
 0x556   : > { %v3258_v51 = vpop.permute.xlu0 %3257 }
 0x557   : > { %v3260_v52 = vmul.f32 %v3258_v51, %v3241_v44 }
 0x559   : > { %v3261_v54 = vpack.c.bf16 %v3260_v52, %v3260_v52  ;;  %v3123_v52 = vpop.f32.mrf.mxu0 }
 0x55b   : > { %3263 = vrot.lane.b32.xlu1 %v3261_v54, %s5422_s12  ;;  %v3124_v54 = vadd.f32 %v6398_v58, %v3123_v52 }
 0x5cd   : > { %v3264_v55 = vpop.permute.xlu1 %3263 }
 0x5ce   : > { %4931 = vmatmul.msk.bf16.vlgmr.msra.gmra.mxu3 %vm3091_vm0, %v3264_v55 }
 0x651   : > { %v3277_v61 = vpop.f32.mrf.mxu3 }
 0x652   : > { %v3281_v62 = vadd.f32 %v3277_v61, %v3119_v59 }
 0x654   : > { %5306 = vtanh.f32 %v3281_v62  ;;  %v4932_v1 = vmul.f32 -1.442695, %v3281_v62 }
 0x656   : > { %5308 = vpow2.f32 %v4932_v1 }
 0x659   : > { %v3279_v63 = vpop.f32.mrf.mxu3 }
 0x65a   : > { %v5307_v0 = vpop.eup %5306 }
 0x65b   : > { %3304 = vrot.lane.b32.xlu2 %v5307_v0, %s5421_s30 }
 0x65c   : > { %v5309_v2 = vpop.eup %5308 }
 0x65d   : > { %v3285_v3 = vadd.f32 1.0, %v5309_v2 }
 0x65f   : > { %5310 = vrcp.f32 %v3285_v3  ;;  %v3297_v9 = vand.u32 2147483648, %v3285_v3  ;;  %vm3291_vm10 = vweird.f32 %v3285_v3  ;;  %v3295_v10 = vand.u32 2147483647, %v3285_v3 }
 0x661   : > { %v3298_v12 = vor.u32 1.1754944e-38, %v3297_v9  ;;  %vm3296_vm12 = vcmp.eq.f32.partialorder %v3295_v10, 8.507059e+37 }
 0x665   : > { %v5311_v4 = vpop.eup %5310 }
 0x666   : > { %v3287_v5 = vmul.f32 %v5311_v4, %v3285_v3  ;;  %vm3292_vm9 = vweird.f32 %v5311_v4 }
 0x667   : > { %vm3293_vm11 = vmor %vm3291_vm10, %vm3292_vm9 }
 0x668   : > { %v3288_v6 = vsub.f32 1.0, %v3287_v5 }
 0x66a   : > { %v3289_v7 = vmul.f32 %v5311_v4, %v3288_v6 }
 0x66c   : > { %v3290_v8 = vadd.f32 %v5311_v4, %v3289_v7 }
 0x66e   : > { %v3294_v11 = vsel %vm3293_vm11, %v5311_v4, %v3290_v8 }
 0x66f   : > { %v3299_v14 = vsel %vm3296_vm12, %v3298_v12, %v3294_v11 }
 0x670   : > { %v3302_v16 = vmul.f32 %v3299_v14, %v3254_v48 }
 0x6b5   : > { %v3305_v13 = vpop.permute.xlu2 %3304 }
 0x6b6   : > { %v3307_v15 = vmul.f32 %v3305_v13, %v3299_v14 }
 0x6b8   : > { %3309 = vrot.lane.b32.xlu0 %v3307_v15, %s5422_s12 }
 0x72a   : > { %v3310_v17 = vpop.permute.xlu0 %3309 }
 0x72b   : > { %v3312_v18 = vadd.f32 %v3310_v17, %v3302_v16 }
 0x72d   : > { %5312 = vtanh.f32 %v3312_v18 }
 0x733   : > { %v5313_v19 = vpop.eup %5312 }
 0x734   : > { %3315 = vrot.lane.b32.xlu1 %v5313_v19, %s5421_s30 }
 0x7a6   : > { %v3316_v20 = vpop.permute.xlu1 %3315 }
 0x7a7   : > { %v3318_v21 = vmul.f32 %v3316_v20, %v3299_v14 }
 0x7a9   : > { %v3319_v22 = vpack.c.bf16 %v3318_v21, %v3318_v21  ;;  %v3125_v21 = vpop.f32.mrf.mxu0 }
 0x7ab   : > { %3321 = vrot.lane.b32.xlu2 %v3319_v22, %s5422_s12  ;;  %v3126_v22 = vadd.f32 %v6398_v58, %v3125_v21 }
 0x805   : > { %v3322_v23 = vpop.permute.xlu2 %3321 }
 0x806   : > { %4933 = vmatmul.msk.bf16.vlgmr.msrb.gmra.mxu1 %vm3091_vm0, %v3322_v23 }
 0x883   : > { %v3335_v26 = vpop.f32.mrf.mxu1 }
 0x884   : > { %v3339_v27 = vadd.f32 %v3335_v26, %v3121_v25 }
 0x886   : > { %5314 = vtanh.f32 %v3339_v27  ;;  %v4934_v30 = vmul.f32 -1.442695, %v3339_v27 }
 0x888   : > { %5316 = vpow2.f32 %v4934_v30 }
 0x88b   : > { %v3337_v28 = vpop.f32.mrf.mxu1 }
 0x88c   : > { %v5315_v29 = vpop.eup %5314 }
 0x88d   : > { %3362 = vrot.lane.b32.xlu0 %v5315_v29, %s5421_s30 }
 0x88e   : > { %v5317_v31 = vpop.eup %5316 }
 0x88f   : > { %v3343_v32 = vadd.f32 1.0, %v5317_v31 }
 0x891   : > { %5318 = vrcp.f32 %v3343_v32  ;;  %v3355_v53 = vand.u32 2147483648, %v3343_v32  ;;  %vm3349_vm14 = vweird.f32 %v3343_v32  ;;  %v3353_v38 = vand.u32 2147483647, %v3343_v32 }
 0x893   : > { %v3356_v39 = vor.u32 1.1754944e-38, %v3355_v53  ;;  %vm3354_vm1 = vcmp.eq.f32.partialorder %v3353_v38, 8.507059e+37 }
 0x897   : > { %v5319_v33 = vpop.eup %5318 }
 0x898   : > { %v3345_v34 = vmul.f32 %v5319_v33, %v3343_v32  ;;  %vm3350_vm13 = vweird.f32 %v5319_v33 }
 0x899   : > { %vm3351_vm15 = vmor %vm3349_vm14, %vm3350_vm13 }
 0x89a   : > { %v3346_v35 = vsub.f32 1.0, %v3345_v34 }
 0x89c   : > { %v3347_v36 = vmul.f32 %v5319_v33, %v3346_v35 }
 0x89e   : > { %v3348_v37 = vadd.f32 %v5319_v33, %v3347_v36 }
 0x8a0   : > { %v3352_v60 = vsel %vm3351_vm15, %v5319_v33, %v3348_v37 }
 0x8a1   : > { %v3357_v41 = vsel %vm3354_vm1, %v3356_v39, %v3352_v60 }
 0x8a2   : > { %v3360_v43 = vmul.f32 %v3357_v41, %v3312_v18 }
 0x8ff   : > { %v3363_v40 = vpop.permute.xlu0 %3362 }
 0x900   : > { %v3365_v42 = vmul.f32 %v3363_v40, %v3357_v41 }
 0x902   : > { %3367 = vrot.lane.b32.xlu1 %v3365_v42, %s5422_s12 }
 0x974   : > { %v3368_v44 = vpop.permute.xlu1 %3367 }
 0x975   : > { %v3370_v45 = vadd.f32 %v3368_v44, %v3360_v43  ;;  %v5237_v44 = vld [vmem:[%s6504_s1 + $0x18] sm:$0xff] }
 0x976   : > { %4919 = vmatmul.msk.bf16.gmra.mxu0 %vm3091_vm0, %v5237_v44  ;;  %v3042_v44 = vmax.f32 %v6393_v57, 0.0 }
 0x977   : > { %5320 = vtanh.f32 %v3370_v45 }
 0x97d   : > { %v5321_v46 = vpop.eup %5320 }
 0x97e   : > { %3373 = vrot.lane.b32.xlu2 %v5321_v46, %s5421_s30 }
 0x9d8   : > { %v3374_v48 = vpop.permute.xlu2 %3373 }
 0x9d9   : > { %v3376_v49 = vmul.f32 %v3374_v48, %v3357_v41 }
 0x9db   : > { %v3377_v50 = vpack.c.bf16 %v3376_v49, %v3376_v49 }
 0x9dd   : > { %3379 = vrot.lane.b32.xlu0 %v3377_v50, %s5422_s12 }
 0x9f3   : > { %v3128_v49 = vpop.f32.mrf.mxu0 }
 0x9f4   : > { %v3129_v50 = vadd.f32 %v6398_v58, %v3128_v49  ;;  %v5424_v49 = vmov 0.0  }
 0xa4f   : > { %v3380_v51 = vpop.permute.xlu0 %3379 }
 0xa50   : > { %4935 = vmatmul.msk.bf16.vlgmr.msrb.gmra.mxu2 %vm3091_vm0, %v3380_v51 }
 0xad3   : > { %v3393_v55 = vpop.f32.mrf.mxu2 }
 0xad4   : > { %v3397_v56 = vadd.f32 %v3393_v55, %v3124_v54 }
 0xad6   : > { %5322 = vtanh.f32 %v3397_v56  ;;  %v4936_v62 = vmul.f32 -1.442695, %v3397_v56 }
 0xad8   : > { %5324 = vpow2.f32 %v4936_v62 }
 0xadb   : > { %v3395_v59 = vpop.f32.mrf.mxu2 }
 0xadc   : > { %v5323_v61 = vpop.eup %5322 }
 0xadd   : > { %3420 = vrot.lane.b32.xlu1 %v5323_v61, %s5421_s30 }
 0xade   : > { %v5325_v63 = vpop.eup %5324 }
 0xadf   : > { %v3401_v0 = vadd.f32 1.0, %v5325_v63 }
 0xae1   : > { %5326 = vrcp.f32 %v3401_v0  ;;  %v3413_v6 = vand.u32 2147483648, %v3401_v0  ;;  %vm3407_vm3 = vweird.f32 %v3401_v0  ;;  %v3411_v7 = vand.u32 2147483647, %v3401_v0 }
 0xae3   : > { %v3414_v9 = vor.u32 1.1754944e-38, %v3413_v6  ;;  %vm3412_vm5 = vcmp.eq.f32.partialorder %v3411_v7, 8.507059e+37 }
 0xae7   : > { %v5327_v1 = vpop.eup %5326 }
 0xae8   : > { %v3403_v2 = vmul.f32 %v5327_v1, %v3401_v0  ;;  %vm3408_vm2 = vweird.f32 %v5327_v1 }
 0xae9   : > { %vm3409_vm4 = vmor %vm3407_vm3, %vm3408_vm2  ;;  %vm3655_vm3 = vcmask 7168  }
 0xaea   : > { %v3404_v3 = vsub.f32 1.0, %v3403_v2  ;;  %3657 = vst.msk [vmem:[#allocation4] sm:$0xff] %vm3655_vm3, %v5424_v49 }
 0xaec   : > { %v3405_v4 = vmul.f32 %v5327_v1, %v3404_v3 }
 0xaee   : > { %v3406_v5 = vadd.f32 %v5327_v1, %v3405_v4 }
 0xaf0   : > { %v3410_v8 = vsel %vm3409_vm4, %v5327_v1, %v3406_v5  ;;  %vm3653_vm4 = vcmask 257024  }
 0xaf1   : > { %v3415_v11 = vsel %vm3412_vm5, %v3414_v9, %v3410_v8 }
 0xaf2   : > { %v3418_v13 = vmul.f32 %v3415_v11, %v3370_v45 }
 0xb4f   : > { %v3421_v10 = vpop.permute.xlu1 %3420 }
 0xb50   : > { %v3423_v12 = vmul.f32 %v3421_v10, %v3415_v11 }
 0xb52   : > { %3425 = vrot.lane.b32.xlu2 %v3423_v12, %s5422_s12 }
 0xbac   : > { %v3426_v14 = vpop.permute.xlu2 %3425 }
 0xbad   : > { %v3428_v15 = vadd.f32 %v3426_v14, %v3418_v13 }
 0xbaf   : > { %5328 = vtanh.f32 %v3428_v15 }
 0xbb5   : > { %v5329_v16 = vpop.eup %5328 }
 0xbb6   : > { %3431 = vrot.lane.b32.xlu0 %v5329_v16, %s5421_s30 }
 0xc28   : > { %v3432_v17 = vpop.permute.xlu0 %3431 }
 0xc29   : > { %v3434_v18 = vmul.f32 %v3432_v17, %v3415_v11 }
 0xc2b   : > { %v3435_v19 = vpack.c.bf16 %v3434_v18, %v3434_v18  ;;  %v3130_v18 = vpop.f32.mrf.mxu0 }
 0xc2d   : > { %3437 = vrot.lane.b32.xlu1 %v3435_v19, %s5422_s12  ;;  %v3131_v19 = vadd.f32 %v6398_v58, %v3130_v18 }
 0xc9f   : > { %v3438_v20 = vpop.permute.xlu1 %3437 }
 0xca0   : > { %4937 = vmatmul.msk.bf16.vlgmr.msrb.gmra.mxu3 %vm3091_vm0, %v3438_v20 }
 0xd23   : > { %v3451_v23 = vpop.f32.mrf.mxu3 }
 0xd24   : > { %v3455_v24 = vadd.f32 %v3451_v23, %v3126_v22 }
 0xd26   : > { %5330 = vtanh.f32 %v3455_v24  ;;  %v4938_v27 = vmul.f32 -1.442695, %v3455_v24 }
 0xd28   : > { %5332 = vpow2.f32 %v4938_v27 }
 0xd2b   : > { %v3453_v25 = vpop.f32.mrf.mxu3 }
 0xd2c   : > { %v5331_v26 = vpop.eup %5330 }
 0xd2d   : > { %3478 = vrot.lane.b32.xlu2 %v5331_v26, %s5421_s30 }
 0xd2e   : > { %v5333_v28 = vpop.eup %5332 }
 0xd2f   : > { %v3459_v29 = vadd.f32 1.0, %v5333_v28 }
 0xd31   : > { %5334 = vrcp.f32 %v3459_v29  ;;  %v3471_v35 = vand.u32 2147483648, %v3459_v29  ;;  %vm3465_vm7 = vweird.f32 %v3459_v29  ;;  %v3469_v36 = vand.u32 2147483647, %v3459_v29 }
 0xd33   : > { %v3472_v53 = vor.u32 1.1754944e-38, %v3471_v35  ;;  %vm3470_vm9 = vcmp.eq.f32.partialorder %v3469_v36, 8.507059e+37 }
 0xd37   : > { %v5335_v30 = vpop.eup %5334 }
 0xd38   : > { %v3461_v31 = vmul.f32 %v5335_v30, %v3459_v29  ;;  %vm3466_vm6 = vweird.f32 %v5335_v30 }
 0xd39   : > { %vm3467_vm8 = vmor %vm3465_vm7, %vm3466_vm6 }
 0xd3a   : > { %v3462_v32 = vsub.f32 1.0, %v3461_v31 }
 0xd3c   : > { %v3463_v33 = vmul.f32 %v5335_v30, %v3462_v32 }
 0xd3e   : > { %v3464_v34 = vadd.f32 %v5335_v30, %v3463_v33 }
 0xd40   : > { %v3468_v37 = vsel %vm3467_vm8, %v5335_v30, %v3464_v34 }
 0xd41   : > { %v3473_v60 = vsel %vm3470_vm9, %v3472_v53, %v3468_v37 }
 0xd42   : > { %v3476_v40 = vmul.f32 %v3473_v60, %v3428_v15 }
 0xd87   : > { %v3479_v38 = vpop.permute.xlu2 %3478 }
 0xd88   : > { %v3481_v39 = vmul.f32 %v3479_v38, %v3473_v60 }
 0xd8a   : > { %3483 = vrot.lane.b32.xlu0 %v3481_v39, %s5422_s12 }
 0xdfc   : > { %v3484_v41 = vpop.permute.xlu0 %3483 }
 0xdfd   : > { %v3486_v42 = vadd.f32 %v3484_v41, %v3476_v40  ;;  %v5243_v40 = vld [vmem:[%s6510_s7 + $0x8] sm:$0xff]  ;;  %v5242_v41 = vld [vmem:[%s6510_s7] sm:$0xff] }
 0xdfe   : > { %3644 = vmatpush.bf16.msra.mxu3 %v5243_v40 }
 0xdff   : > { %5336 = vtanh.f32 %v3486_v42 }
 0xe02   : > { %3645 = vmatpush.bf16.msra.mxu3 %v5242_v41 }
 0xe05   : > { %v5337_v43 = vpop.eup %5336 }
 0xe06   : > { %3489 = vrot.lane.b32.xlu1 %v5337_v43, %s5421_s30 }
 0xe78   : > { %v3490_v45 = vpop.permute.xlu1 %3489 }
 0xe79   : > { %v3492_v46 = vmul.f32 %v3490_v45, %v3473_v60 }
 0xe7b   : > { %v3493_v47 = vpack.c.bf16 %v3492_v46, %v3492_v46 }
 0xe7d   : > { %3495 = vrot.lane.b32.xlu2 %v3493_v47, %s5422_s12 }
 0xed7   : > { %v3496_v48 = vpop.permute.xlu2 %3495 }
 0xed8   : > { %4939 = vmatmul.msk.bf16.vlgmr.msra.gmra.mxu1 %vm3091_vm0, %v3496_v48  ;;  %v5423_v48 = vmov -inf  }
 0xed9   : > { %3656 = vst.msk [vmem:[#allocation3] sm:$0xff] %vm3655_vm3, %v5423_v48 }
 0xf55   : > { %v3509_v51 = vpop.f32.mrf.mxu1 }
 0xf56   : > { %v3513_v52 = vadd.f32 %v3509_v51, %v3129_v50  ;;  %v5289_v50 = vld [vmem:[%s6511_s8] ss:$0 sm:$0xff] }
 0xf58   : > { %5338 = vtanh.f32 %v3513_v52  ;;  %v4940_v56 = vmul.f32 -1.442695, %v3513_v52 }
 0xf5a   : > { %5340 = vpow2.f32 %v4940_v56 }
 0xf5d   : > { %v3511_v54 = vpop.f32.mrf.mxu1 }
 0xf5e   : > { %v5339_v55 = vpop.eup %5338 }
 0xf5f   : > { %3536 = vrot.lane.b32.xlu0 %v5339_v55, %s5421_s30 }
 0xf60   : > { %v5341_v59 = vpop.eup %5340 }
 0xf61   : > { %v3517_v61 = vadd.f32 1.0, %v5341_v59 }
 0xf63   : > { %5342 = vrcp.f32 %v3517_v61  ;;  %v3529_v3 = vand.u32 2147483648, %v3517_v61  ;;  %vm3523_vm11 = vweird.f32 %v3517_v61  ;;  %v3527_v4 = vand.u32 2147483647, %v3517_v61 }
 0xf65   : > { %v3530_v6 = vor.u32 1.1754944e-38, %v3529_v3  ;;  %vm3528_vm13 = vcmp.eq.f32.partialorder %v3527_v4, 8.507059e+37 }
 0xf69   : > { %v5343_v62 = vpop.eup %5342 }
 0xf6a   : > { %v3519_v63 = vmul.f32 %v5343_v62, %v3517_v61  ;;  %vm3524_vm10 = vweird.f32 %v5343_v62 }
 0xf6b   : > { %vm3525_vm12 = vmor %vm3523_vm11, %vm3524_vm10 }
 0xf6c   : > { %v3520_v0 = vsub.f32 1.0, %v3519_v63 }
 0xf6e   : > { %v3521_v1 = vmul.f32 %v5343_v62, %v3520_v0 }
 0xf70   : > { %v3522_v2 = vadd.f32 %v5343_v62, %v3521_v1 }
 0xf72   : > { %v3526_v5 = vsel %vm3525_vm12, %v5343_v62, %v3522_v2 }
 0xf73   : > { %v3531_v8 = vsel %vm3528_vm13, %v3530_v6, %v3526_v5 }
 0xf74   : > { %v3534_v10 = vmul.f32 %v3531_v8, %v3486_v42 }
 0xfd1   : > { %v3537_v7 = vpop.permute.xlu0 %3536 }
 0xfd2   : > { %v3539_v9 = vmul.f32 %v3537_v7, %v3531_v8 }
 0xfd4   : > { %3541 = vrot.lane.b32.xlu1 %v3539_v9, %s5422_s12 }
0x1046   : > { %v3542_v11 = vpop.permute.xlu1 %3541 }
0x1047   : > { %v3544_v12 = vadd.f32 %v3542_v11, %v3534_v10 }
0x1049   : > { %5344 = vtanh.f32 %v3544_v12 }
0x104f   : > { %v5345_v13 = vpop.eup %5344 }
0x1050   : > { %3547 = vrot.lane.b32.xlu2 %v5345_v13, %s5421_s30 }
0x10aa   : > { %v3548_v14 = vpop.permute.xlu2 %3547 }
0x10ab   : > { %v3550_v15 = vmul.f32 %v3548_v14, %v3531_v8 }
0x10ad   : > { %v3551_v16 = vpack.c.bf16 %v3550_v15, %v3550_v15 }
0x10af   : > { %3553 = vrot.lane.b32.xlu0 %v3551_v16, %s5422_s12 }
0x1121   : > { %v3554_v17 = vpop.permute.xlu0 %3553 }
0x1122   : > { %4941 = vmatmul.msk.bf16.vlgmr.msra.gmra.mxu2 %vm3091_vm0, %v3554_v17 }
0x11a5   : > { %v3567_v20 = vpop.f32.mrf.mxu2 }
0x11a6   : > { %v3571_v21 = vadd.f32 %v3567_v20, %v3131_v19 }
0x11a8   : > { %5346 = vtanh.f32 %v3571_v21  ;;  %v4942_v24 = vmul.f32 -1.442695, %v3571_v21 }
0x11aa   : > { %5348 = vpow2.f32 %v4942_v24 }
0x11ad   : > { %v3569_v22 = vpop.f32.mrf.mxu2 }
0x11ae   : > { %v5347_v23 = vpop.eup %5346 }
0x11af   : > { %3594 = vrot.lane.b32.xlu1 %v5347_v23, %s5421_s30 }
0x11b0   : > { %v5349_v25 = vpop.eup %5348 }
0x11b1   : > { %v3575_v26 = vadd.f32 1.0, %v5349_v25 }
0x11b3   : > { %5350 = vrcp.f32 %v3575_v26  ;;  %v3587_v32 = vand.u32 2147483648, %v3575_v26  ;;  %vm3581_vm15 = vweird.f32 %v3575_v26  ;;  %v3585_v58 = vand.u32 2147483647, %v3575_v26 }
0x11b5   : > { %v3588_v34 = vor.u32 1.1754944e-38, %v3587_v32  ;;  %vm3586_vm2 = vcmp.eq.f32.partialorder %v3585_v58, 8.507059e+37 }
0x11b9   : > { %v5351_v27 = vpop.eup %5350 }
0x11ba   : > { %v3577_v28 = vmul.f32 %v5351_v27, %v3575_v26  ;;  %vm3582_vm14 = vweird.f32 %v5351_v27 }
0x11bb   : > { %vm3583_vm1 = vmor %vm3581_vm15, %vm3582_vm14 }
0x11bc   : > { %v3578_v29 = vsub.f32 1.0, %v3577_v28 }
0x11be   : > { %v3579_v30 = vmul.f32 %v5351_v27, %v3578_v29 }
0x11c0   : > { %v3580_v31 = vadd.f32 %v5351_v27, %v3579_v30 }
0x11c2   : > { %v3584_v33 = vsel %vm3583_vm1, %v5351_v27, %v3580_v31 }
0x11c3   : > { %v3589_v36 = vsel %vm3586_vm2, %v3588_v34, %v3584_v33 }
0x11c4   : > { %v3592_v53 = vmul.f32 %v3589_v36, %v3544_v12 }
0x1221   : > { %v3595_v35 = vpop.permute.xlu1 %3594 }
0x1222   : > { %v3597_v37 = vmul.f32 %v3595_v35, %v3589_v36 }
0x1224   : > { %3599 = vrot.lane.b32.xlu2 %v3597_v37, %s5422_s12 }
0x127e   : > { %v3600_v38 = vpop.permute.xlu2 %3599 }
0x127f   : > { %v3602_v60 = vadd.f32 %v3600_v38, %v3592_v53 }
0x1281   : > { %5352 = vtanh.f32 %v3602_v60 }
0x1287   : > { %v5353_v39 = vpop.eup %5352 }
0x1288   : > { %3605 = vrot.lane.b32.xlu0 %v5353_v39, %s5421_s30 }
0x12fa   : > { %v3606_v42 = vpop.permute.xlu0 %3605 }
0x12fb   : > { %v3608_v43 = vmul.f32 %v3606_v42, %v3589_v36 }
0x12fd   : > { %3610 = vrot.lane.b32.xlu1 %v3608_v43, %s5422_s12 }
0x136f   : > { %v3611_v45 = vpop.permute.xlu1 %3610 }
0x1370   : > { %v3613_v46 = vadd.f32 %v3611_v45, %v3042_v44 }
0x1372   : > { %v3614_v47 = vpack.c.bf16 %v3613_v46, %v3613_v46 }
0x1374   : > { %4951 = vmatmul.msk.bf16.vlgmr.msra.gmra.mxu3 %vm3091_vm0, %v3614_v47 }
0x13f7   : > { %v3647_v51 = vpop.f32.mrf.mxu3 }
0x13f8   : > { %v3648_v52 = vadd.f32 %v5289_v50, %v3647_v51 }
0x13fa   : > { %v3651_v54 = vmax.f32 %v3648_v52, 0.0 }
0x13fc   : > { %v3652_v55 = vpack.c.bf16 %v3651_v54, %v3651_v54 }
0x13fe   : > { %3654 = vst.msk [vmem:[#allocation2] sm:$0xf] %vm3653_vm4, %v3652_v55 }
0x13ff   : > { %v3649_v57 = vpop.f32.mrf.mxu3 }
0x1400 PF: > { %v4962_v56 = vld [vmem:[%s5534_s25 + $0x10] sm:$0xf]  ;;  %v5247_v59 = vld [vmem:[%s5534_s25 + $0x14] sm:$0xf0]  ;;  %v5246_v61 = vld [vmem:[%s5534_s25 + $0x14] sm:$0xf] }
0x1401   : > { %v4963_v62 = vor.u32 %v5247_v59, %v4962_v56  ;;  %v4964_v63 = vld [vmem:[%s5534_s25 + $0x18] sm:$0xf0]  ;;  %v4954_v0 = vld [vmem:[%s5534_s25] sm:$0xf]  ;;  %v5245_v1 = vld [vmem:[%s5534_s25 + $0x4] sm:$0xf0] }
0x1402   : > { %v4967_v2 = vor.u32 %v5246_v61, %v4964_v63  ;;  %v5244_v3 = vld [vmem:[%s5534_s25 + $0x4] sm:$0xf]  ;;  %v4956_v4 = vld [vmem:[%s5534_s25 + $0x8] sm:$0xf0]  ;;  %v4955_v5 = vor.u32 %v5245_v1, %v4954_v0  ;;  %vm3689_vm0 = vcmask 261120   ;;  %s5248_s16 = sshll.u32 %s5504_s20, 4 }
0x1403   : > { %3699 = vmatpush.bf16.msra.mxu0 %v4963_v62  ;;  %v4959_v6 = vor.u32 %v5244_v3, %v4956_v4  ;;  %v3663_v8 = vld [vmem:[%s439_s23] sm:$0x3]  ;;  %s3721_s25 = scalar_lea.vmem [#allocation5], %s5248_s16  ;;  %v5425_v18 = vmov 0   ;;  %v3724_v19 = vld [vmem:[#allocation3] sm:$0xff]  ;;  %vm3749_vm5 = vcmask 7168  }
0x1404   : > { %3712 = vmatpush.bf16.msra.mxu1 %v4967_v2  ;;  %v3665_v9 = vperm.slane %v3663_v8, 0  ;;  %v3666_v10 = vperm.slane %v3663_v8, 1  ;;  %5354 = vset.pattern.permute.xlu0 %v5425_v18  ;;  %v3729_v58 = vld [vmem:[#allocation4] sm:$0xff]  ;;  %p4972_p10 = scmp.ne.s32.totalorder %s5504_s20, 3 }
0x1405   : > { %v3658_v7 = vld [vmem:[#allocation2] sm:$0xf] }
0x1407   : > { %3700 = vmatpush.bf16.msra.mxu0 %v4955_v5 }
0x1408   : > { %3713 = vmatpush.bf16.msra.mxu1 %v4959_v6 }
0x140a   : > { %4968 = vmatmul.msk.bf16.vlgmr.msra.gmra.mxu0 %vm3689_vm0, %v3658_v7 }
0x140b   : > { %4969 = vmatmul.msk.bf16.vlgmr.msra.gmra.mxu1 %vm3689_vm0, %v3658_v7 }
0x1487   : > { %v3702_v11 = vpop.f32.mrf.mxu0 }
0x1488   : > { %v3703_v12 = vadd.f32 %v3702_v11, %v3665_v9  ;;  %v3715_v13 = vpop.f32.mrf.mxu1 }
0x1489   : > { %v3716_v14 = vadd.f32 %v3715_v13, %v3666_v10 }
0x148a   : > { %3722 = vst [vmem:[%s3721_s25] sm:$0xff] %v3703_v12 }
0x148b   : > { %3723 = vst [vmem:[%s3721_s25 + $0x8] sm:$0xff] %v3716_v14  ;;  %v3725_v15 = vmax.f32 %v3703_v12, %v3716_v14 }
0x148d   : > { %3726 = vmax.xlane.f32.xlu0 %v3725_v15 }
0x148f   : > { %v3704_v16 = vpop.f32.mrf.mxu0 }
0x1490   : > { %v3717_v17 = vpop.f32.mrf.mxu1 }
0x1500   : > { %v3727_v20 = vpop.xlane.xlu0 %3726 }
0x1501   : > { %v3728_v21 = vmax.f32 %v3724_v19, %v3727_v20 }
0x1503   : > { %v3730_v22 = vsub.f32 %v3724_v19, %v3728_v21  ;;  %3751 = vst.msk [vmem:[#allocation3] sm:$0xff] %vm3749_vm5, %v3728_v21  ;;  %3736 = vperm.xlu0 %5354, %v3728_v21  }
0x1505   : > { %v3731_v31 = vmul.f32 1.442695, %v3730_v22 }
0x1575   : > { %v3737_v23 = vpop.permute.xlu0 %3736 }
0x1576   : > { %v3739_v24 = vsub.f32 %v3703_v12, %v3737_v23  ;;  %v3740_v25 = vsub.f32 %v3716_v14, %v3737_v23 }
0x1578   : > { %v3741_v26 = vmul.f32 1.442695, %v3739_v24  ;;  %v3743_v27 = vmul.f32 1.442695, %v3740_v25 }
0x157a   : > { %5355 = vpow2.f32 %v3741_v26 }
0x157b   : > { %5357 = vpow2.f32 %v3743_v27 }
0x157c   : > { %5359 = vpow2.f32 %v3731_v31 }
0x1580   : > { %v5356_v28 = vpop.eup %5355 }
0x1581   : > { %v5358_v29 = vpop.eup %5357 }
0x1582   : > { %v3745_v30 = vadd.f32 %v5358_v29, %v5356_v28  ;;  %v5360_v32 = vpop.eup %5359 }
0x1583   : > { %v3733_v33 = vmul.f32 %v5360_v32, %v3729_v58 }
0x1584   : > { %3746 = vadd.xlane.f32.xlu1 %v3745_v30 }
0x15f6   : > { %3755 = sbr.rel (%p4972_p10) target bundleno = 5770 (0x168a), region = 110 }
0x15f7   : > { %v3747_v34 = vpop.xlane.xlu1 %3746 }
0x15f8   : > { %v3748_v35 = vadd.f32 %v3747_v34, %v3733_v33 }
0x15fa   : > { %3750 = vst.msk [vmem:[#allocation4] sm:$0xff] %vm3749_vm5, %v3748_v35 }
0x15fb   : > { %v5426_v37 = vmov 0   ;;  %v3756_v38 = vld [vmem:[#allocation3] sm:$0xff]  ;;  %v3761_v40 = vld [vmem:[#allocation5] sm:$0xff]  ;;  %v3762_v41 = vld [vmem:[#allocation5 + $0x8] sm:$0xff] }
0x15fc   : > { %5361 = vset.pattern.permute.xlu0 %v5426_v37  ;;  %v3773_v42 = vld [vmem:[#allocation5 + $0x10] sm:$0xff]  ;;  %v3774_v43 = vld [vmem:[#allocation5 + $0x18] sm:$0xff]  ;;  %v3780_v44 = vld [vmem:[#allocation5 + $0x20] sm:$0xff] }
0x15fd   : > { %v3781_v46 = vld [vmem:[#allocation5 + $0x28] sm:$0xff]  ;;  %v3787_v50 = vld [vmem:[#allocation5 + $0x30] sm:$0xff]  ;;  %v3788_v52 = vld [vmem:[#allocation5 + $0x38] sm:$0xff] }
0x1601   : > { %v3757_v36 = vld [vmem:[#allocation4] sm:$0xff] }
0x1602   : > { %5362 = vlog2.f32 %v3757_v36 }
0x1608   : > { %v5363_v53 = vpop.eup %5362 }
0x1609   : > { %v3759_v60 = vmul.f32 0.6931472, %v5363_v53 }
0x160b   : > { %v3760_v39 = vadd.f32 %v3759_v60, %v3756_v38 }
0x160d   : > { %3765 = vperm.xlu0 %5361, %v3760_v39  }
0x167f   : > { %v3766_v45 = vpop.permute.xlu0 %3765 }
0x1680   : > { %v3768_v47 = vsub.f32 %v3761_v40, %v3766_v45  ;;  %v3769_v48 = vsub.f32 %v3762_v41, %v3766_v45  ;;  %v3775_v49 = vsub.f32 %v3773_v42, %v3766_v45  ;;  %v3776_v51 = vsub.f32 %v3774_v43, %v3766_v45 }
0x1681   : > { %v3782_v54 = vsub.f32 %v3780_v44, %v3766_v45  ;;  %v3783_v55 = vsub.f32 %v3781_v46, %v3766_v45  ;;  %v3789_v57 = vsub.f32 %v3787_v50, %v3766_v45  ;;  %v3790_v56 = vsub.f32 %v3788_v52, %v3766_v45 }
0x1682   : > { %3770 = vst [vmem:[#allocation7] sm:$0xff] %v3768_v47 }
0x1683   : > { %3771 = vst [vmem:[#allocation7 + $0x8] sm:$0xff] %v3769_v48 }
0x1684   : > { %3777 = vst [vmem:[#allocation7 + $0x10] sm:$0xff] %v3775_v49 }
0x1685   : > { %3778 = vst [vmem:[#allocation7 + $0x18] sm:$0xff] %v3776_v51 }
0x1686   : > { %3784 = vst [vmem:[#allocation7 + $0x20] sm:$0xff] %v3782_v54 }
0x1687   : > { %3785 = vst [vmem:[#allocation7 + $0x28] sm:$0xff] %v3783_v55 }
0x1688   : > { %3791 = vst [vmem:[#allocation7 + $0x30] sm:$0xff] %v3789_v57 }
0x1689   : > { %3792 = vst [vmem:[#allocation7 + $0x38] sm:$0xff] %v3790_v56 }
0x168a PF: > { %p5253_p11 = scmp.eq.s32.totalorder %s5504_s20, 3  ;;  %s5427_s14 = smov [#allocation7]  }
0x168b   : > { %s3799_s23 = sshll.u32 %s5427_s14, 4  ;;  %s3801_s26 = sshll.u32 %s6514_s11, 4  ;;  %s3800_s23 = int_to_ptr.vmem [resolvable:$true] %s3799_s23  ;;  %s3802_s26 = int_to_ptr.hbm [resolvable:$true] %s3801_s26 }
0x168c   : > { %5250 = dma.vmem_to_hbm [thread:$0]  (%p5253_p11), %s3800_s23, 1024, %s3802_s26, [#allocation8]  }
0x168d   : > { %5405 = dma.done.wait (%p5253_p11), [#allocation8], 1024  }
0x168e   : > { %5407 = vsyncadd (%p5253_p11), [#allocation8], 4294966272 }
0x168f PF: > { %p19_p12 = scmp.ge.s32.totalorder %s5507_s21, 6   ;;  %s6515_s17 = smov %s5414_s18 }
0x1690   : > { %s6516_s18 = smov %s5516_s24  ;;  %s6517_s19 = smov %s5507_s21 }
0x1691   :  { %21 = sbr.rel (!%p19_p12) target bundleno = 2 (0x2), region = 149 }
0x1696   :  { %3815 = vsyncpa [#allocation8], 1 }
0x1697   :  { %3817 = vsyncpa [#allocation8 + $0x1], 1 }

</bundles_post_ra>
